<compile_context>
chip_gen: v6e
topology: v6e:2x2x1
jax: 0.10.0
libtpu: 0.0.40
codegen_flags: <defaults>
</compile_context>

<pallas_src>
import functools

import jax
import jax.numpy as jnp
from jax import lax
from jax.experimental import pallas as pl
from jax.experimental.pallas import tpu as pltpu

EMBED_DIM = 32
HIDDEN_DIM = 128
NUM_EXPERTS = 4
NUM_HEADS = 4
HEAD_DIM = EMBED_DIM // NUM_HEADS
VOCAB_SIZE = 15          # digits 0-9, ' ', '+', '-', <PAD>, <UNK>
VOCAB_PAD = 128          # lane-padded vocab for the in-kernel one-hot matmul
MAX_POS = 20
TOP_K = 2
LN_EPS = 1e-5


# ----------------------------- kernel helpers ------------------------------

def _linear(x, w_t, b):
    # x: (N, in), w_t: (in, out) [pre-transposed], b: (1, out) -> (N, out)
    y = lax.dot_general(x, w_t, (((1,), (0,)), ((), ())),
                        preferred_element_type=jnp.float32)
    return y + b


def _seg_layer_norm(v, p_avg, w, b):
    # Per-expert LayerNorm over each E-wide lane segment of the flat layout.
    # p_avg holds 1/E inside each expert's E x E block; ONE stacked matmul over
    # [v ; v*v] yields both the segment mean and E[v^2] (already broadcast),
    # then var = E[v^2] - mu^2.
    n = v.shape[0]
    st = jnp.concatenate([v, v * v], axis=0)                       # (2n, FE)
    mom = lax.dot_general(st, p_avg, (((1,), (0,)), ((), ())),
                          preferred_element_type=jnp.float32)
    mu = mom[:n]
    var = mom[n:] - mu * mu
    return (v - mu) * lax.rsqrt(var + LN_EPS) * w + b


# ----------------------------- fused Pallas kernel --------------------------

def moe_kernel(tok_ref, emb_ref, pos_ref,
               wbig_ref, bbig_ref,
               wo_ref, bo_ref, ln1w_ref, ln1b_ref,
               w1_ref, b1_ref, w2_ref, b2_ref, ln2w_ref, ln2b_ref,
               wg_ref, bg_ref,
               seg_qk_ref, seg_qkt_ref, p_avg_ref, seg_efc_ref, jlt_ref,
               bfc_ref, out_ref, *, B, S):
    """Embedding + gating + all experts (encoder layer) + top-k combine + fc."""
    NE, H, Dh, E = NUM_EXPERTS, NUM_HEADS, HEAD_DIM, EMBED_DIM
    FE = NE * E                                        # flat per-token width (128)
    BS = B * S
    bf16 = jnp.bfloat16

    # ---- embedding lookup (one-hot @ table on the MXU) + positional enc ----
    tok = tok_ref[...]                                             # (BS, 1) int32
    lane = lax.broadcasted_iota(jnp.int32, (BS, VOCAB_PAD), 1)
    onehot = jnp.where(lane == tok, 1.0, 0.0)                      # (BS, 128) f32
    x2 = lax.dot_general(onehot, emb_ref[...], (((1,), (0,)), ((), ())),
                         preferred_element_type=jnp.float32)       # (BS, E)
    x = x2.reshape(B, S, E) + pos_ref[:S, :][None, :, :]           # (B, S, E)
    x2 = x.reshape(BS, E)

    # ---- fused q|k|v|replicated-residual projection: ONE bf16 MXU matmul ---
    qkvr = _linear(x2.astype(bf16), wbig_ref[...], bbig_ref[...])  # (BS, 4*FE)
    q_all = qkvr[:, 0 * FE:1 * FE]
    k_all = qkvr[:, 1 * FE:2 * FE]
    v_all = qkvr[:, 2 * FE:3 * FE]
    x_rep = qkvr[:, 3 * FE:4 * FE]                    # == x2 replicated per expert

    # ---- self-attention across the BATCH axis (batch_first=False semantics),
    #      all experts * heads vectorized in the flat lane layout -------------
    qb = q_all.reshape(B, S, FE)
    kb = k_all.reshape(B, S, FE)
    vb = v_all.reshape(B, S, FE)
    prod = qb[:, None, :, :] * kb[None, :, :, :]                   # (B, B, S, FE)
    scores = lax.dot_general(prod.reshape(B * B * S, FE), seg_qk_ref[...],
                             (((1,), (0,)), ((), ())),
                             preferred_element_type=jnp.float32)   # scale folded in
    scores = scores.reshape(B, B, S, NE * H)
    m = scores.max(axis=1, keepdims=True)                          # softmax over j
    pexp = jnp.exp(scores - m)
    attn = pexp * pl.reciprocal(pexp.sum(axis=1, keepdims=True), approx=True)
    attn_exp = lax.dot_general(attn.reshape(B * B * S, NE * H), seg_qkt_ref[...],
                               (((1,), (0,)), ((), ())),
                               preferred_element_type=jnp.float32)
    ctx = (attn_exp.reshape(B, B, S, FE) * vb[None, :, :, :]).sum(axis=1)
    ctx_flat = ctx.reshape(BS, FE)                                 # heads concat

    # ---- attention out-projection (block-diag) + residual + LayerNorm 1 ----
    attn_out = _linear(ctx_flat.astype(bf16), wo_ref[...], bo_ref[...])
    p_avg = p_avg_ref[...]
    y = _seg_layer_norm(x_rep + attn_out, p_avg, ln1w_ref[...], ln1b_ref[...])

    # ---- feed-forward (block-diag) + residual + LayerNorm 2 -----------------
    hid = jnp.maximum(_linear(y.astype(bf16), w1_ref[...], b1_ref[...]), 0.0)
    ff = _linear(hid.astype(bf16), w2_ref[...], b2_ref[...])
    z = _seg_layer_norm(y + ff, p_avg, ln2w_ref[...], ln2b_ref[...])

    # mean over the sequence axis (dim=1 of the (B, S, E) view), per expert
    expert_out = z.reshape(B, S, FE).mean(axis=1)                  # (B, FE)

    # ---- gating network: mean pool -> linear -> softmax ---------------------
    pooled = x.mean(axis=1)                                        # (B, E)
    logits = _linear(pooled, wg_ref[...], bg_ref[...])             # (B, NE)
    lm = logits.max(axis=-1, keepdims=True)
    gex = jnp.exp(logits - lm)
    gates = gex / gex.sum(axis=-1, keepdims=True)                  # (B, NE)

    # ---- top-k (k=2) selection, NOT renormalized (torch.topk + gather) ------
    # rank[b,e] = #{j : g[b,j] beats g[b,e]} with lower-index tie-break.
    rank = jnp.zeros((B, NE), jnp.float32)
    for j in range(NE):                                            # unrolled, 2-D ops
        gj = gates[:, j:j + 1]                                     # (B, 1)
        rank = (rank
                + jnp.where(gj > gates, 1.0, 0.0)
                + jnp.where(gj == gates, jlt_ref[j:j + 1, :], 0.0))
    gates_top = jnp.where(rank < TOP_K, gates, 0.0)                # (B, NE)

    # ---- weighted combine + final fc folded into a lane reduction -----------
    # seg_efc[e, d] = wfc[d % E] iff d // E == e  ->  gates_fc = gate * wfc per lane
    gates_fc = lax.dot_general(gates_top, seg_efc_ref[...],
                               (((1,), (0,)), ((), ())),
                               preferred_element_type=jnp.float32)  # (B, FE)
    out_ref[...] = (gates_fc * expert_out).sum(axis=-1, keepdims=True) + bfc_ref[...]


# ----------------------------- weight re-layout ------------------------------

def _block_diag(w):
    # w: (NE, out, in) -> (NE*out, NE*in) block diagonal
    ne, o, i = w.shape
    eye = jnp.eye(ne, dtype=w.dtype)
    return (eye[:, None, :, None] * w[:, :, None, :]).reshape(ne * o, ne * i)


def prepare_params(p):
    """One-time re-layout of PyTorch params into the kernel's stacked/flat layout.

    All weights are pre-transposed to (in, out) so every in-kernel dot is the
    MXU-native ((1,),(0,)) contraction; the large ones are stored in bf16.
    """
    E, Hd, NE, H, Dh = EMBED_DIM, HIDDEN_DIM, NUM_EXPERTS, NUM_HEADS, HEAD_DIM
    FE = NE * E
    f32, bf16 = jnp.float32, jnp.bfloat16
    wqkv, bqkv = p["wqkv"], p["bqkv"]                  # (NE,3E,E), (NE,1,3E)

    def stack_proj(lo, hi):
        w = wqkv[:, lo:hi, :].reshape(NE * E, E)       # (FE, E)  (out, in)
        b = bqkv[:, 0, lo:hi].reshape(1, NE * E)       # (1, FE)
        return w, b

    wq, bq = stack_proj(0, E)
    wk, bk = stack_proj(E, 2 * E)
    wv, bv = stack_proj(2 * E, 3 * E)
    rep = jnp.tile(jnp.eye(E, dtype=f32), (NE, 1))                       # (FE, E)
    w_big = jnp.concatenate([wq, wk, wv, rep], axis=0)                   # (4FE, E)
    b_big = jnp.concatenate([bq, bk, bv, jnp.zeros((1, FE), f32)], axis=1)

    emb_pad = jnp.zeros((VOCAB_PAD, E), f32).at[:VOCAB_SIZE].set(
        p["embedding"].astype(f32))

    wfc_rep = jnp.tile(p["wfc"].astype(f32), (1, NE))                    # (1, FE)
    seg_efc = jnp.repeat(jnp.eye(NE, dtype=f32), E, axis=1) * wfc_rep    # (NE, FE)

    return {
        "emb_pad": emb_pad,                                              # (128, E)
        "pos_enc": p["pos_enc"].astype(f32).reshape(MAX_POS, E),         # (20, E)
        "w_big_t": w_big.T.astype(bf16),                                 # (E, 4FE)
        "b_big": b_big.astype(f32),                                      # (1, 4FE)
        "wo_t": _block_diag(p["wo"]).T.astype(bf16),                     # (FE, FE)
        "bo": p["bo"].reshape(1, FE).astype(f32),
        "ln1w": p["ln1w"].reshape(1, FE).astype(f32),
        "ln1b": p["ln1b"].reshape(1, FE).astype(f32),
        "w1_t": _block_diag(p["w1"]).T.astype(bf16),                     # (FE, NE*Hd)
        "b1": p["b1"].reshape(1, NE * Hd).astype(f32),
        "w2_t": _block_diag(p["w2"]).T.astype(bf16),                     # (NE*Hd, FE)
        "b2": p["b2"].reshape(1, FE).astype(f32),
        "ln2w": p["ln2w"].reshape(1, FE).astype(f32),
        "ln2b": p["ln2b"].reshape(1, FE).astype(f32),
        "wg_t": p["wg"].T.astype(f32),                                   # (E, NE)
        "bg": p["bg"].astype(f32),
        # constant segment/reduction matrices (1/sqrt(Dh) folded into seg_qk)
        "seg_qk": (jnp.repeat(jnp.eye(NE * H, dtype=f32), Dh, axis=0)
                   * (1.0 / (Dh ** 0.5))),                               # (FE, NE*H)
        "seg_qk_t": jnp.repeat(jnp.eye(NE * H, dtype=f32), Dh, axis=1),  # (NE*H, FE)
        "p_avg": jnp.kron(jnp.eye(NE, dtype=f32),
                          jnp.full((E, E), 1.0 / E, dtype=f32)),         # (FE, FE)
        "seg_efc": seg_efc,                                              # (NE, FE)
        "jlt": jnp.triu(jnp.ones((NE, NE), f32), k=1),                   # [j,e]=1 if j<e
        "bfc": p["bfc"].astype(f32),                                     # (1, 1)
    }


# ----------------------------- wrapper ---------------------------------------

def moe_transformer_forward(tokens, kp):
    B, S = tokens.shape
    BS, FE, NH = B * S, NUM_EXPERTS * EMBED_DIM, NUM_EXPERTS * NUM_HEADS
    tok2d = tokens.reshape(BS, 1).astype(jnp.int32)

    args = (tok2d, kp["emb_pad"], kp["pos_enc"],
            kp["w_big_t"], kp["b_big"],
            kp["wo_t"], kp["bo"], kp["ln1w"], kp["ln1b"],
            kp["w1_t"], kp["b1"], kp["w2_t"], kp["b2"], kp["ln2w"], kp["ln2b"],
            kp["wg_t"], kp["bg"],
            kp["seg_qk"], kp["seg_qk_t"], kp["p_avg"], kp["seg_efc"], kp["jlt"],
            kp["bfc"])

    vmem = pl.BlockSpec(memory_space=pltpu.MemorySpace.VMEM)
    flops = int(
        2 * BS * VOCAB_PAD * EMBED_DIM                 # one-hot embedding
        + 2 * BS * EMBED_DIM * 4 * FE                  # fused q|k|v|rep
        + 2 * (B * B * S) * FE * NH                    # per-head score reduce
        + 2 * (B * B * S) * NH * FE                    # attention expand
        + 2 * BS * FE * FE                             # attention out-proj
        + 2 * (2 * BS) * FE * FE * 2                   # 2 stacked LayerNorm dots
        + 2 * BS * FE * (NUM_EXPERTS * HIDDEN_DIM)     # FFN 1
        + 2 * BS * (NUM_EXPERTS * HIDDEN_DIM) * FE     # FFN 2
        + 2 * B * EMBED_DIM * NUM_EXPERTS              # gating
        + 2 * B * NUM_EXPERTS * FE)                    # gate expansion
    transcendentals = int(B * B * S * NH + B * S * NH + 2 * BS * FE
                          + B * NUM_EXPERTS)
    bytes_accessed = int(sum(a.size * a.dtype.itemsize for a in args) + B * 4)

    kernel = functools.partial(moe_kernel, B=B, S=S)
    return pl.pallas_call(
        kernel,
        out_shape=jax.ShapeDtypeStruct((B, 1), jnp.float32),
        in_specs=[vmem] * len(args),
        out_specs=vmem,
        cost_estimate=pl.CostEstimate(flops=flops,
                                      transcendentals=transcendentals,
                                      bytes_accessed=bytes_accessed),
    )(*args)


# ----------------------------- pure-JAX reference ---------------------------

def reference_forward(tokens, p):
    B, S = tokens.shape
    E, H, Dh = EMBED_DIM, NUM_HEADS, HEAD_DIM
    x = (p["embedding"][tokens] + p["pos_enc"][:, :S, :]).astype(jnp.float32)

    pooled = x.mean(axis=1)
    gw = jax.nn.softmax(pooled @ p["wg"].T + p["bg"], axis=-1)

    def ln(v_, w, b):
        mu = v_.mean(-1, keepdims=True)
        var = ((v_ - mu) ** 2).mean(-1, keepdims=True)
        return (v_ - mu) / jnp.sqrt(var + LN_EPS) * w + b

    outs = []
    for e in range(NUM_EXPERTS):
        x2 = x.reshape(B * S, E)
        qkv = x2 @ p["wqkv"][e].T + p["bqkv"][e]
        q = qkv[:, :E].reshape(B, S, H, Dh)
        k = qkv[:, E:2 * E].reshape(B, S, H, Dh)
        v = qkv[:, 2 * E:].reshape(B, S, H, Dh)
        scores = jnp.einsum('ishd,jshd->ijsh', q, k) / (Dh ** 0.5)
        attn = jax.nn.softmax(scores, axis=1)
        ctx = jnp.einsum('ijsh,jshd->ishd', attn, v).reshape(B * S, E)
        attn_out = ctx @ p["wo"][e].T + p["bo"][e]
        y = ln(x2 + attn_out, p["ln1w"][e], p["ln1b"][e])
        hct = jax.nn.relu(y @ p["w1"][e].T + p["b1"][e])
        f = hct @ p["w2"][e].T + p["b2"][e]
        z = ln(y + f, p["ln2w"][e], p["ln2b"][e])
        outs.append(z.reshape(B, S, E).mean(axis=1))
    all_out = jnp.stack(outs, axis=1)                                # (B, NE, E)
    gt, ti = lax.top_k(gw, TOP_K)
    top = jnp.take_along_axis(all_out, ti[:, :, None], axis=1)
    w = (top * gt[:, :, None]).sum(axis=1)
    return w @ p["wfc"].T + p["bfc"]


# ----------------------------- params & main --------------------------------

def init_params(key):
    E, Hd, NE = EMBED_DIM, HIDDEN_DIM, NUM_EXPERTS
    ks = jax.random.split(key, 14)

    def nrm(k, shape, s=0.1):
        return (s * jax.random.normal(k, shape)).astype(jnp.float32)

    return {
        "embedding": nrm(ks[0], (VOCAB_SIZE, E)),
        "pos_enc":   nrm(ks[1], (1, MAX_POS, E), 0.02),
        "wg":        nrm(ks[2], (NE, E)),
        "bg":        nrm(ks[3], (1, NE)),
        "wqkv":      nrm(ks[4], (NE, 3 * E, E)),
        "bqkv":      nrm(ks[5], (NE, 1, 3 * E)),
        "wo":        nrm(ks[6], (NE, E, E)),
        "bo":        nrm(ks[7], (NE, 1, E)),
        "ln1w":      jnp.ones((NE, 1, E), jnp.float32),
        "ln1b":      jnp.zeros((NE, 1, E), jnp.float32),
        "ln2w":      jnp.ones((NE, 1, E), jnp.float32),
        "ln2b":      jnp.zeros((NE, 1, E), jnp.float32),
        "w1":        nrm(ks[8], (NE, Hd, E)),
        "b1":        nrm(ks[9], (NE, 1, Hd)),
        "w2":        nrm(ks[10], (NE, E, Hd)),
        "b2":        nrm(ks[11], (NE, 1, E)),
        "wfc":       nrm(ks[12], (1, E)),
        "bfc":       nrm(ks[13], (1, 1)),
    }


if __name__ == "__main__":
    key = jax.random.PRNGKey(0)
    pkey, tkey = jax.random.split(key)
    params = init_params(pkey)
    kparams = prepare_params(params)        # one-time weight re-layout (bf16 big weights)

    B, S = 2, 8
    tokens = jax.random.randint(tkey, (B, S), 0, VOCAB_SIZE, dtype=jnp.int32)

    out = jax.jit(moe_transformer_forward)(tokens, kparams)
    out = jax.block_until_ready(out)

    ref = reference_forward(tokens, params)
    assert out.shape == (B, 1), out.shape
    # Tolerance covers bf16-stored weights + approx reciprocal in the softmax.
    assert jnp.allclose(out, ref, atol=1e-2, rtol=1e-2), (out, ref)
    print("KERNEL_OK")
</pallas_src>

<mosaic_0001>
module attributes {stable_mosaic.version = 11 : i64} {
  func.func @moe_kernel(%arg0: memref<16x1xi32, #tpu.memory_space<vmem>>, %arg1: memref<128x32xf32, #tpu.memory_space<vmem>>, %arg2: memref<20x32xf32, #tpu.memory_space<vmem>>, %arg3: memref<32x512xbf16, #tpu.memory_space<vmem>>, %arg4: memref<1x512xf32, #tpu.memory_space<vmem>>, %arg5: memref<128x128xbf16, #tpu.memory_space<vmem>>, %arg6: memref<1x128xf32, #tpu.memory_space<vmem>>, %arg7: memref<1x128xf32, #tpu.memory_space<vmem>>, %arg8: memref<1x128xf32, #tpu.memory_space<vmem>>, %arg9: memref<128x512xbf16, #tpu.memory_space<vmem>>, %arg10: memref<1x512xf32, #tpu.memory_space<vmem>>, %arg11: memref<512x128xbf16, #tpu.memory_space<vmem>>, %arg12: memref<1x128xf32, #tpu.memory_space<vmem>>, %arg13: memref<1x128xf32, #tpu.memory_space<vmem>>, %arg14: memref<1x128xf32, #tpu.memory_space<vmem>>, %arg15: memref<32x4xf32, #tpu.memory_space<vmem>>, %arg16: memref<1x4xf32, #tpu.memory_space<vmem>>, %arg17: memref<128x16xf32, #tpu.memory_space<vmem>>, %arg18: memref<16x128xf32, #tpu.memory_space<vmem>>, %arg19: memref<128x128xf32, #tpu.memory_space<vmem>>, %arg20: memref<4x128xf32, #tpu.memory_space<vmem>>, %arg21: memref<4x4xf32, #tpu.memory_space<vmem>>, %arg22: memref<1x1xf32, #tpu.memory_space<vmem>>, %arg23: memref<2x1xf32, #tpu.memory_space<vmem>>) attributes {dimension_semantics = [], scalar_prefetch = 0 : i64, scratch_operands = 0 : i64, tpu.core_type = #tpu.core_type<tc>} {
    %c0 = arith.constant 0 : index
    %c0_0 = arith.constant 0 : index
    %0 = vector.load %arg0[%c0, %c0_0] : memref<16x1xi32, #tpu.memory_space<vmem>>, vector<16x1xi32>
    %1 = tpu.iota {dimensions = array<i32: 1>} : vector<16x128xi32>
    %2 = vector.broadcast %0 : vector<16x1xi32> to vector<16x128xi32>
    %3 = arith.cmpi eq, %1, %2 : vector<16x128xi32>
    %cst = arith.constant 1.000000e+00 : f32
    %cst_1 = arith.constant 0.000000e+00 : f32
    %4 = vector.broadcast %cst : f32 to vector<16x128xf32>
    %5 = vector.broadcast %cst_1 : f32 to vector<16x128xf32>
    %6 = arith.select %3, %4, %5 : vector<16x128xi1>, vector<16x128xf32>
    %c0_2 = arith.constant 0 : index
    %c0_3 = arith.constant 0 : index
    %7 = vector.load %arg1[%c0_2, %c0_3] : memref<128x32xf32, #tpu.memory_space<vmem>>, vector<128x32xf32>
    %cst_4 = arith.constant dense<0.000000e+00> : vector<16x32xf32>
    %8 = tpu.matmul %6, %7, %cst_4 {dimension_numbers = #tpu.dot_dimension_numbers<[1], [0], [0], [1], [0, 0, 1, 1], [], []>} : vector<16x128xf32>, vector<128x32xf32>, vector<16x32xf32> -> vector<16x32xf32>
    %9 = vector.shape_cast %8 : vector<16x32xf32> to vector<2x8x32xf32>
    %c0_5 = arith.constant 0 : index
    %c0_6 = arith.constant 0 : index
    %10 = vector.load %arg2[%c0_5, %c0_6] : memref<20x32xf32, #tpu.memory_space<vmem>>, vector<8x32xf32>
    %11 = vector.shape_cast %10 : vector<8x32xf32> to vector<1x8x32xf32>
    %12 = vector.broadcast %11 : vector<1x8x32xf32> to vector<2x8x32xf32>
    %13 = arith.addf %9, %12 : vector<2x8x32xf32>
    %14 = vector.shape_cast %13 : vector<2x8x32xf32> to vector<16x32xf32>
    %15 = arith.truncf %14 : vector<16x32xf32> to vector<16x32xbf16>
    %c0_7 = arith.constant 0 : index
    %c0_8 = arith.constant 0 : index
    %16 = vector.load %arg3[%c0_7, %c0_8] : memref<32x512xbf16, #tpu.memory_space<vmem>>, vector<32x512xbf16>
    %c0_9 = arith.constant 0 : index
    %c0_10 = arith.constant 0 : index
    %17 = vector.load %arg4[%c0_9, %c0_10] : memref<1x512xf32, #tpu.memory_space<vmem>>, vector<1x512xf32>
    %cst_11 = arith.constant dense<0.000000e+00> : vector<16x512xf32>
    %18 = tpu.matmul %15, %16, %cst_11 {dimension_numbers = #tpu.dot_dimension_numbers<[1], [0], [0], [1], [0, 0, 1, 1], [], []>} : vector<16x32xbf16>, vector<32x512xbf16>, vector<16x512xf32> -> vector<16x512xf32>
    %19 = vector.broadcast %17 : vector<1x512xf32> to vector<16x512xf32>
    %20 = arith.addf %18, %19 : vector<16x512xf32>
    %21 = vector.extract_strided_slice %20 {offsets = [0, 0], sizes = [16, 128], strides = [1, 1]} : vector<16x512xf32> to vector<16x128xf32>
    %22 = vector.extract_strided_slice %20 {offsets = [0, 128], sizes = [16, 128], strides = [1, 1]} : vector<16x512xf32> to vector<16x128xf32>
    %23 = vector.extract_strided_slice %20 {offsets = [0, 256], sizes = [16, 128], strides = [1, 1]} : vector<16x512xf32> to vector<16x128xf32>
    %24 = vector.extract_strided_slice %20 {offsets = [0, 384], sizes = [16, 128], strides = [1, 1]} : vector<16x512xf32> to vector<16x128xf32>
    %25 = vector.shape_cast %21 : vector<16x128xf32> to vector<2x8x128xf32>
    %26 = vector.shape_cast %22 : vector<16x128xf32> to vector<2x8x128xf32>
    %27 = vector.shape_cast %23 : vector<16x128xf32> to vector<2x8x128xf32>
    %28 = vector.shape_cast %25 : vector<2x8x128xf32> to vector<2x1x8x128xf32>
    %29 = vector.shape_cast %26 : vector<2x8x128xf32> to vector<1x2x8x128xf32>
    %30 = vector.broadcast %28 : vector<2x1x8x128xf32> to vector<2x2x8x128xf32>
    %31 = vector.broadcast %29 : vector<1x2x8x128xf32> to vector<2x2x8x128xf32>
    %32 = arith.mulf %30, %31 : vector<2x2x8x128xf32>
    %33 = vector.shape_cast %32 : vector<2x2x8x128xf32> to vector<32x128xf32>
    %c0_12 = arith.constant 0 : index
    %c0_13 = arith.constant 0 : index
    %34 = vector.load %arg17[%c0_12, %c0_13] : memref<128x16xf32, #tpu.memory_space<vmem>>, vector<128x16xf32>
    %cst_14 = arith.constant dense<0.000000e+00> : vector<32x16xf32>
    %35 = tpu.matmul %33, %34, %cst_14 {dimension_numbers = #tpu.dot_dimension_numbers<[1], [0], [0], [1], [0, 0, 1, 1], [], []>} : vector<32x128xf32>, vector<128x16xf32>, vector<32x16xf32> -> vector<32x16xf32>
    %36 = vector.shape_cast %35 : vector<32x16xf32> to vector<2x2x8x16xf32>
    %cst_15 = arith.constant dense<0xFF800000> : vector<2x8x16xf32>
    %37 = vector.multi_reduction <maximumf>, %36, %cst_15 [1] : vector<2x2x8x16xf32> to vector<2x8x16xf32>
    %38 = vector.shape_cast %37 : vector<2x8x16xf32> to vector<2x1x8x16xf32>
    %39 = vector.broadcast %38 : vector<2x1x8x16xf32> to vector<2x2x8x16xf32>
    %40 = arith.subf %36, %39 : vector<2x2x8x16xf32>
    %41 = math.exp %40 : vector<2x2x8x16xf32>
    %cst_16 = arith.constant dense<0.000000e+00> : vector<2x8x16xf32>
    %42 = vector.multi_reduction <add>, %41, %cst_16 [1] : vector<2x2x8x16xf32> to vector<2x8x16xf32>
    %43 = vector.shape_cast %42 : vector<2x8x16xf32> to vector<2x1x8x16xf32>
    %44 = tpu.reciprocal %43 {approx = true} : vector<2x1x8x16xf32> -> vector<2x1x8x16xf32>
    %45 = vector.broadcast %44 : vector<2x1x8x16xf32> to vector<2x2x8x16xf32>
    %46 = arith.mulf %41, %45 : vector<2x2x8x16xf32>
    %47 = vector.shape_cast %46 : vector<2x2x8x16xf32> to vector<32x16xf32>
    %c0_17 = arith.constant 0 : index
    %c0_18 = arith.constant 0 : index
    %48 = vector.load %arg18[%c0_17, %c0_18] : memref<16x128xf32, #tpu.memory_space<vmem>>, vector<16x128xf32>
    %cst_19 = arith.constant dense<0.000000e+00> : vector<32x128xf32>
    %49 = tpu.matmul %47, %48, %cst_19 {dimension_numbers = #tpu.dot_dimension_numbers<[1], [0], [0], [1], [0, 0, 1, 1], [], []>} : vector<32x16xf32>, vector<16x128xf32>, vector<32x128xf32> -> vector<32x128xf32>
    %50 = vector.shape_cast %49 : vector<32x128xf32> to vector<2x2x8x128xf32>
    %51 = vector.shape_cast %27 : vector<2x8x128xf32> to vector<1x2x8x128xf32>
    %52 = vector.broadcast %51 : vector<1x2x8x128xf32> to vector<2x2x8x128xf32>
    %53 = arith.mulf %50, %52 : vector<2x2x8x128xf32>
    %cst_20 = arith.constant dense<0.000000e+00> : vector<2x8x128xf32>
    %54 = vector.multi_reduction <add>, %53, %cst_20 [1] : vector<2x2x8x128xf32> to vector<2x8x128xf32>
    %55 = vector.shape_cast %54 : vector<2x8x128xf32> to vector<16x128xf32>
    %56 = arith.truncf %55 : vector<16x128xf32> to vector<16x128xbf16>
    %c0_21 = arith.constant 0 : index
    %c0_22 = arith.constant 0 : index
    %57 = vector.load %arg5[%c0_21, %c0_22] : memref<128x128xbf16, #tpu.memory_space<vmem>>, vector<128x128xbf16>
    %c0_23 = arith.constant 0 : index
    %c0_24 = arith.constant 0 : index
    %58 = vector.load %arg6[%c0_23, %c0_24] : memref<1x128xf32, #tpu.memory_space<vmem>>, vector<1x128xf32>
    %cst_25 = arith.constant dense<0.000000e+00> : vector<16x128xf32>
    %59 = tpu.matmul %56, %57, %cst_25 {dimension_numbers = #tpu.dot_dimension_numbers<[1], [0], [0], [1], [0, 0, 1, 1], [], []>} : vector<16x128xbf16>, vector<128x128xbf16>, vector<16x128xf32> -> vector<16x128xf32>
    %60 = vector.broadcast %58 : vector<1x128xf32> to vector<16x128xf32>
    %61 = arith.addf %59, %60 : vector<16x128xf32>
    %c0_26 = arith.constant 0 : index
    %c0_27 = arith.constant 0 : index
    %62 = vector.load %arg19[%c0_26, %c0_27] : memref<128x128xf32, #tpu.memory_space<vmem>>, vector<128x128xf32>
    %63 = arith.addf %24, %61 : vector<16x128xf32>
    %c0_28 = arith.constant 0 : index
    %c0_29 = arith.constant 0 : index
    %64 = vector.load %arg7[%c0_28, %c0_29] : memref<1x128xf32, #tpu.memory_space<vmem>>, vector<1x128xf32>
    %c0_30 = arith.constant 0 : index
    %c0_31 = arith.constant 0 : index
    %65 = vector.load %arg8[%c0_30, %c0_31] : memref<1x128xf32, #tpu.memory_space<vmem>>, vector<1x128xf32>
    %66 = arith.mulf %63, %63 : vector<16x128xf32>
    %67 = tpu.concatenate %63, %66 in 0 : vector<16x128xf32>, vector<16x128xf32> -> vector<32x128xf32>
    %cst_32 = arith.constant dense<0.000000e+00> : vector<32x128xf32>
    %68 = tpu.matmul %67, %62, %cst_32 {dimension_numbers = #tpu.dot_dimension_numbers<[1], [0], [0], [1], [0, 0, 1, 1], [], []>} : vector<32x128xf32>, vector<128x128xf32>, vector<32x128xf32> -> vector<32x128xf32>
    %69 = vector.extract_strided_slice %68 {offsets = [0, 0], sizes = [16, 128], strides = [1, 1]} : vector<32x128xf32> to vector<16x128xf32>
    %70 = vector.extract_strided_slice %68 {offsets = [16, 0], sizes = [16, 128], strides = [1, 1]} : vector<32x128xf32> to vector<16x128xf32>
    %71 = arith.mulf %69, %69 : vector<16x128xf32>
    %72 = arith.subf %70, %71 : vector<16x128xf32>
    %73 = arith.subf %63, %69 : vector<16x128xf32>
    %cst_33 = arith.constant 9.99999974E-6 : f32
    %74 = vector.broadcast %cst_33 : f32 to vector<16x128xf32>
    %75 = arith.addf %72, %74 : vector<16x128xf32>
    %76 = math.rsqrt %75 : vector<16x128xf32>
    %77 = arith.mulf %73, %76 : vector<16x128xf32>
    %78 = vector.broadcast %64 : vector<1x128xf32> to vector<16x128xf32>
    %79 = arith.mulf %77, %78 : vector<16x128xf32>
    %80 = vector.broadcast %65 : vector<1x128xf32> to vector<16x128xf32>
    %81 = arith.addf %79, %80 : vector<16x128xf32>
    %82 = arith.truncf %81 : vector<16x128xf32> to vector<16x128xbf16>
    %c0_34 = arith.constant 0 : index
    %c0_35 = arith.constant 0 : index
    %83 = vector.load %arg9[%c0_34, %c0_35] : memref<128x512xbf16, #tpu.memory_space<vmem>>, vector<128x512xbf16>
    %c0_36 = arith.constant 0 : index
    %c0_37 = arith.constant 0 : index
    %84 = vector.load %arg10[%c0_36, %c0_37] : memref<1x512xf32, #tpu.memory_space<vmem>>, vector<1x512xf32>
    %cst_38 = arith.constant dense<0.000000e+00> : vector<16x512xf32>
    %85 = tpu.matmul %82, %83, %cst_38 {dimension_numbers = #tpu.dot_dimension_numbers<[1], [0], [0], [1], [0, 0, 1, 1], [], []>} : vector<16x128xbf16>, vector<128x512xbf16>, vector<16x512xf32> -> vector<16x512xf32>
    %86 = vector.broadcast %84 : vector<1x512xf32> to vector<16x512xf32>
    %87 = arith.addf %85, %86 : vector<16x512xf32>
    %cst_39 = arith.constant 0.000000e+00 : f32
    %88 = vector.broadcast %cst_39 : f32 to vector<16x512xf32>
    %89 = arith.maximumf %87, %88 : vector<16x512xf32>
    %90 = arith.truncf %89 : vector<16x512xf32> to vector<16x512xbf16>
    %c0_40 = arith.constant 0 : index
    %c0_41 = arith.constant 0 : index
    %91 = vector.load %arg11[%c0_40, %c0_41] : memref<512x128xbf16, #tpu.memory_space<vmem>>, vector<512x128xbf16>
    %c0_42 = arith.constant 0 : index
    %c0_43 = arith.constant 0 : index
    %92 = vector.load %arg12[%c0_42, %c0_43] : memref<1x128xf32, #tpu.memory_space<vmem>>, vector<1x128xf32>
    %cst_44 = arith.constant dense<0.000000e+00> : vector<16x128xf32>
    %93 = tpu.matmul %90, %91, %cst_44 {dimension_numbers = #tpu.dot_dimension_numbers<[1], [0], [0], [1], [0, 0, 1, 1], [], []>} : vector<16x512xbf16>, vector<512x128xbf16>, vector<16x128xf32> -> vector<16x128xf32>
    %94 = vector.broadcast %92 : vector<1x128xf32> to vector<16x128xf32>
    %95 = arith.addf %93, %94 : vector<16x128xf32>
    %96 = arith.addf %81, %95 : vector<16x128xf32>
    %c0_45 = arith.constant 0 : index
    %c0_46 = arith.constant 0 : index
    %97 = vector.load %arg13[%c0_45, %c0_46] : memref<1x128xf32, #tpu.memory_space<vmem>>, vector<1x128xf32>
    %c0_47 = arith.constant 0 : index
    %c0_48 = arith.constant 0 : index
    %98 = vector.load %arg14[%c0_47, %c0_48] : memref<1x128xf32, #tpu.memory_space<vmem>>, vector<1x128xf32>
    %99 = arith.mulf %96, %96 : vector<16x128xf32>
    %100 = tpu.concatenate %96, %99 in 0 : vector<16x128xf32>, vector<16x128xf32> -> vector<32x128xf32>
    %cst_49 = arith.constant dense<0.000000e+00> : vector<32x128xf32>
    %101 = tpu.matmul %100, %62, %cst_49 {dimension_numbers = #tpu.dot_dimension_numbers<[1], [0], [0], [1], [0, 0, 1, 1], [], []>} : vector<32x128xf32>, vector<128x128xf32>, vector<32x128xf32> -> vector<32x128xf32>
    %102 = vector.extract_strided_slice %101 {offsets = [0, 0], sizes = [16, 128], strides = [1, 1]} : vector<32x128xf32> to vector<16x128xf32>
    %103 = vector.extract_strided_slice %101 {offsets = [16, 0], sizes = [16, 128], strides = [1, 1]} : vector<32x128xf32> to vector<16x128xf32>
    %104 = arith.mulf %102, %102 : vector<16x128xf32>
    %105 = arith.subf %103, %104 : vector<16x128xf32>
    %106 = arith.subf %96, %102 : vector<16x128xf32>
    %cst_50 = arith.constant 9.99999974E-6 : f32
    %107 = vector.broadcast %cst_50 : f32 to vector<16x128xf32>
    %108 = arith.addf %105, %107 : vector<16x128xf32>
    %109 = math.rsqrt %108 : vector<16x128xf32>
    %110 = arith.mulf %106, %109 : vector<16x128xf32>
    %111 = vector.broadcast %97 : vector<1x128xf32> to vector<16x128xf32>
    %112 = arith.mulf %110, %111 : vector<16x128xf32>
    %113 = vector.broadcast %98 : vector<1x128xf32> to vector<16x128xf32>
    %114 = arith.addf %112, %113 : vector<16x128xf32>
    %115 = vector.shape_cast %114 : vector<16x128xf32> to vector<2x8x128xf32>
    %cst_51 = arith.constant dense<0.000000e+00> : vector<2x128xf32>
    %116 = vector.multi_reduction <add>, %115, %cst_51 [1] : vector<2x8x128xf32> to vector<2x128xf32>
    %cst_52 = arith.constant 8.000000e+00 : f32
    %117 = vector.broadcast %cst_52 : f32 to vector<2x128xf32>
    %118 = arith.divf %116, %117 : vector<2x128xf32>
    %cst_53 = arith.constant dense<0.000000e+00> : vector<2x32xf32>
    %119 = vector.multi_reduction <add>, %13, %cst_53 [1] : vector<2x8x32xf32> to vector<2x32xf32>
    %cst_54 = arith.constant 8.000000e+00 : f32
    %120 = vector.broadcast %cst_54 : f32 to vector<2x32xf32>
    %121 = arith.divf %119, %120 : vector<2x32xf32>
    %c0_55 = arith.constant 0 : index
    %c0_56 = arith.constant 0 : index
    %122 = vector.load %arg15[%c0_55, %c0_56] : memref<32x4xf32, #tpu.memory_space<vmem>>, vector<32x4xf32>
    %c0_57 = arith.constant 0 : index
    %c0_58 = arith.constant 0 : index
    %123 = vector.load %arg16[%c0_57, %c0_58] : memref<1x4xf32, #tpu.memory_space<vmem>>, vector<1x4xf32>
    %cst_59 = arith.constant dense<0.000000e+00> : vector<2x4xf32>
    %124 = tpu.matmul %121, %122, %cst_59 {dimension_numbers = #tpu.dot_dimension_numbers<[1], [0], [0], [1], [0, 0, 1, 1], [], []>} : vector<2x32xf32>, vector<32x4xf32>, vector<2x4xf32> -> vector<2x4xf32>
    %125 = vector.broadcast %123 : vector<1x4xf32> to vector<2x4xf32>
    %126 = arith.addf %124, %125 : vector<2x4xf32>
    %cst_60 = arith.constant dense<0xFF800000> : vector<2xf32>
    %127 = vector.multi_reduction <maximumf>, %126, %cst_60 [1] : vector<2x4xf32> to vector<2xf32>
    %128 = vector.shape_cast %127 : vector<2xf32> to vector<2x1xf32>
    %129 = vector.broadcast %128 : vector<2x1xf32> to vector<2x4xf32>
    %130 = arith.subf %126, %129 : vector<2x4xf32>
    %131 = math.exp %130 : vector<2x4xf32>
    %cst_61 = arith.constant dense<0.000000e+00> : vector<2xf32>
    %132 = vector.multi_reduction <add>, %131, %cst_61 [1] : vector<2x4xf32> to vector<2xf32>
    %133 = vector.shape_cast %132 : vector<2xf32> to vector<2x1xf32>
    %134 = vector.broadcast %133 : vector<2x1xf32> to vector<2x4xf32>
    %135 = arith.divf %131, %134 : vector<2x4xf32>
    %cst_62 = arith.constant 0.000000e+00 : f32
    %136 = vector.broadcast %cst_62 : f32 to vector<2x4xf32>
    %137 = vector.extract_strided_slice %135 {offsets = [0, 0], sizes = [2, 1], strides = [1, 1]} : vector<2x4xf32> to vector<2x1xf32>
    %138 = vector.broadcast %137 : vector<2x1xf32> to vector<2x4xf32>
    %139 = arith.cmpf ogt, %138, %135 : vector<2x4xf32>
    %cst_63 = arith.constant 1.000000e+00 : f32
    %cst_64 = arith.constant 0.000000e+00 : f32
    %140 = vector.broadcast %cst_63 : f32 to vector<2x4xf32>
    %141 = vector.broadcast %cst_64 : f32 to vector<2x4xf32>
    %142 = arith.select %139, %140, %141 : vector<2x4xi1>, vector<2x4xf32>
    %143 = arith.addf %136, %142 : vector<2x4xf32>
    %144 = vector.broadcast %137 : vector<2x1xf32> to vector<2x4xf32>
    %145 = arith.cmpf oeq, %144, %135 : vector<2x4xf32>
    %c0_65 = arith.constant 0 : index
    %c0_66 = arith.constant 0 : index
    %146 = vector.load %arg21[%c0_65, %c0_66] : memref<4x4xf32, #tpu.memory_space<vmem>>, vector<1x4xf32>
    %cst_67 = arith.constant 0.000000e+00 : f32
    %147 = vector.shape_cast %146 : vector<1x4xf32> to vector<1x4xf32>
    %148 = vector.broadcast %147 : vector<1x4xf32> to vector<2x4xf32>
    %149 = vector.broadcast %cst_67 : f32 to vector<2x4xf32>
    %150 = arith.select %145, %148, %149 : vector<2x4xi1>, vector<2x4xf32>
    %151 = arith.addf %143, %150 : vector<2x4xf32>
    %152 = vector.extract_strided_slice %135 {offsets = [0, 1], sizes = [2, 1], strides = [1, 1]} : vector<2x4xf32> to vector<2x1xf32>
    %153 = vector.broadcast %152 : vector<2x1xf32> to vector<2x4xf32>
    %154 = arith.cmpf ogt, %153, %135 : vector<2x4xf32>
    %cst_68 = arith.constant 1.000000e+00 : f32
    %cst_69 = arith.constant 0.000000e+00 : f32
    %155 = vector.broadcast %cst_68 : f32 to vector<2x4xf32>
    %156 = vector.broadcast %cst_69 : f32 to vector<2x4xf32>
    %157 = arith.select %154, %155, %156 : vector<2x4xi1>, vector<2x4xf32>
    %158 = arith.addf %151, %157 : vector<2x4xf32>
    %159 = vector.broadcast %152 : vector<2x1xf32> to vector<2x4xf32>
    %160 = arith.cmpf oeq, %159, %135 : vector<2x4xf32>
    %c1 = arith.constant 1 : index
    %c0_70 = arith.constant 0 : index
    %161 = vector.load %arg21[%c1, %c0_70] : memref<4x4xf32, #tpu.memory_space<vmem>>, vector<1x4xf32>
    %cst_71 = arith.constant 0.000000e+00 : f32
    %162 = vector.shape_cast %161 : vector<1x4xf32> to vector<1x4xf32>
    %163 = vector.broadcast %162 : vector<1x4xf32> to vector<2x4xf32>
    %164 = vector.broadcast %cst_71 : f32 to vector<2x4xf32>
    %165 = arith.select %160, %163, %164 : vector<2x4xi1>, vector<2x4xf32>
    %166 = arith.addf %158, %165 : vector<2x4xf32>
    %167 = vector.extract_strided_slice %135 {offsets = [0, 2], sizes = [2, 1], strides = [1, 1]} : vector<2x4xf32> to vector<2x1xf32>
    %168 = vector.broadcast %167 : vector<2x1xf32> to vector<2x4xf32>
    %169 = arith.cmpf ogt, %168, %135 : vector<2x4xf32>
    %cst_72 = arith.constant 1.000000e+00 : f32
    %cst_73 = arith.constant 0.000000e+00 : f32
    %170 = vector.broadcast %cst_72 : f32 to vector<2x4xf32>
    %171 = vector.broadcast %cst_73 : f32 to vector<2x4xf32>
    %172 = arith.select %169, %170, %171 : vector<2x4xi1>, vector<2x4xf32>
    %173 = arith.addf %166, %172 : vector<2x4xf32>
    %174 = vector.broadcast %167 : vector<2x1xf32> to vector<2x4xf32>
    %175 = arith.cmpf oeq, %174, %135 : vector<2x4xf32>
    %c2 = arith.constant 2 : index
    %c0_74 = arith.constant 0 : index
    %176 = vector.load %arg21[%c2, %c0_74] : memref<4x4xf32, #tpu.memory_space<vmem>>, vector<1x4xf32>
    %cst_75 = arith.constant 0.000000e+00 : f32
    %177 = vector.shape_cast %176 : vector<1x4xf32> to vector<1x4xf32>
    %178 = vector.broadcast %177 : vector<1x4xf32> to vector<2x4xf32>
    %179 = vector.broadcast %cst_75 : f32 to vector<2x4xf32>
    %180 = arith.select %175, %178, %179 : vector<2x4xi1>, vector<2x4xf32>
    %181 = arith.addf %173, %180 : vector<2x4xf32>
    %182 = vector.extract_strided_slice %135 {offsets = [0, 3], sizes = [2, 1], strides = [1, 1]} : vector<2x4xf32> to vector<2x1xf32>
    %183 = vector.broadcast %182 : vector<2x1xf32> to vector<2x4xf32>
    %184 = arith.cmpf ogt, %183, %135 : vector<2x4xf32>
    %cst_76 = arith.constant 1.000000e+00 : f32
    %cst_77 = arith.constant 0.000000e+00 : f32
    %185 = vector.broadcast %cst_76 : f32 to vector<2x4xf32>
    %186 = vector.broadcast %cst_77 : f32 to vector<2x4xf32>
    %187 = arith.select %184, %185, %186 : vector<2x4xi1>, vector<2x4xf32>
    %188 = arith.addf %181, %187 : vector<2x4xf32>
    %189 = vector.broadcast %182 : vector<2x1xf32> to vector<2x4xf32>
    %190 = arith.cmpf oeq, %189, %135 : vector<2x4xf32>
    %c3 = arith.constant 3 : index
    %c0_78 = arith.constant 0 : index
    %191 = vector.load %arg21[%c3, %c0_78] : memref<4x4xf32, #tpu.memory_space<vmem>>, vector<1x4xf32>
    %cst_79 = arith.constant 0.000000e+00 : f32
    %192 = vector.shape_cast %191 : vector<1x4xf32> to vector<1x4xf32>
    %193 = vector.broadcast %192 : vector<1x4xf32> to vector<2x4xf32>
    %194 = vector.broadcast %cst_79 : f32 to vector<2x4xf32>
    %195 = arith.select %190, %193, %194 : vector<2x4xi1>, vector<2x4xf32>
    %196 = arith.addf %188, %195 : vector<2x4xf32>
    %cst_80 = arith.constant 2.000000e+00 : f32
    %197 = vector.broadcast %cst_80 : f32 to vector<2x4xf32>
    %198 = arith.cmpf olt, %196, %197 : vector<2x4xf32>
    %cst_81 = arith.constant 0.000000e+00 : f32
    %199 = vector.broadcast %cst_81 : f32 to vector<2x4xf32>
    %200 = arith.select %198, %135, %199 : vector<2x4xi1>, vector<2x4xf32>
    %c0_82 = arith.constant 0 : index
    %c0_83 = arith.constant 0 : index
    %201 = vector.load %arg20[%c0_82, %c0_83] : memref<4x128xf32, #tpu.memory_space<vmem>>, vector<4x128xf32>
    %cst_84 = arith.constant dense<0.000000e+00> : vector<2x128xf32>
    %202 = tpu.matmul %200, %201, %cst_84 {dimension_numbers = #tpu.dot_dimension_numbers<[1], [0], [0], [1], [0, 0, 1, 1], [], []>} : vector<2x4xf32>, vector<4x128xf32>, vector<2x128xf32> -> vector<2x128xf32>
    %203 = arith.mulf %202, %118 : vector<2x128xf32>
    %cst_85 = arith.constant dense<0.000000e+00> : vector<2xf32>
    %204 = vector.multi_reduction <add>, %203, %cst_85 [1] : vector<2x128xf32> to vector<2xf32>
    %205 = vector.shape_cast %204 : vector<2xf32> to vector<2x1xf32>
    %c0_86 = arith.constant 0 : index
    %c0_87 = arith.constant 0 : index
    %206 = vector.load %arg22[%c0_86, %c0_87] : memref<1x1xf32, #tpu.memory_space<vmem>>, vector<1x1xf32>
    %207 = vector.broadcast %206 : vector<1x1xf32> to vector<2x1xf32>
    %208 = arith.addf %205, %207 : vector<2x1xf32>
    %c0_88 = arith.constant 0 : index
    %c0_89 = arith.constant 0 : index
    %209 = vector.load %arg23[%c0_88, %c0_89] : memref<2x1xf32, #tpu.memory_space<vmem>>, vector<2x1xf32>
    tpu.vector_store %arg23[%c0_88, %c0_89], %208 {strides = array<i32>} : memref<2x1xf32, #tpu.memory_space<vmem>>, vector<2x1xf32>,
    return
  }
}

</mosaic_0001>

<bundles_post_ra>
// kernel: moe_transformer_forward.1
= control target key start
LH: loop header
LB: loop body
LE: loop exit
PB: predicated region body
PF: predicated region fallthrough
CT: control target
= control target key end

     0   :  { %s3706_s0 = inlined_call_operand.vmem [shape: s32[16,1], index: 0, kind: input, shape index: {}]   ;;  %s3707_s1 = inlined_call_operand.vmem [shape: f32[128,32], index: 1, kind: input, shape index: {}]   ;;  %s3708_s2 = inlined_call_operand.hbm [shape: f32[20,32], index: 2, kind: input, shape index: {}]   ;;  %s3709_s3 = inlined_call_operand.hbm [shape: bf16[32,512], index: 3, kind: input, shape index: {}]   ;;  %s3710_s4 = inlined_call_operand.vmem [shape: f32[1,512], index: 4, kind: input, shape index: {}]   ;;  %s3711_s5 = inlined_call_operand.hbm [shape: bf16[128,128], index: 5, kind: input, shape index: {}]   ;;  %s3712_s6 = inlined_call_operand.hbm [shape: f32[1,128], index: 6, kind: input, shape index: {}]   ;;  %s3713_s7 = inlined_call_operand.hbm [shape: f32[1,128], index: 7, kind: input, shape index: {}]   ;;  %s3714_s8 = inlined_call_operand.hbm [shape: f32[1,128], index: 8, kind: input, shape index: {}]   ;;  %s3715_s9 = inlined_call_operand.vmem [shape: bf16[128,512], index: 9, kind: input, shape index: {}]   ;;  %s3716_s10 = inlined_call_operand.hbm [shape: f32[1,512], index: 10, kind: input, shape index: {}]   ;;  %s3717_s11 = inlined_call_operand.hbm [shape: bf16[512,128], index: 11, kind: input, shape index: {}]   ;;  %s3718_s12 = inlined_call_operand.hbm [shape: f32[1,128], index: 12, kind: input, shape index: {}]   ;;  %s3719_s13 = inlined_call_operand.hbm [shape: f32[1,128], index: 13, kind: input, shape index: {}]   ;;  %s3720_s14 = inlined_call_operand.hbm [shape: f32[1,128], index: 14, kind: input, shape index: {}]   ;;  %s3721_s15 = inlined_call_operand.vmem [shape: f32[32,4], index: 15, kind: input, shape index: {}]   ;;  %s3722_s16 = inlined_call_operand.hbm [shape: f32[1,4], index: 16, kind: input, shape index: {}]   ;;  %s3723_s17 = inlined_call_operand.vmem [shape: f32[128,16], index: 17, kind: input, shape index: {}]   ;;  %s3724_s18 = inlined_call_operand.hbm [shape: f32[16,128], index: 18, kind: input, shape index: {}]   ;;  %s3725_s19 = inlined_call_operand.vmem [shape: f32[128,128], index: 19, kind: input, shape index: {}]   ;;  %s3726_s20 = inlined_call_operand.hbm [shape: f32[4,128], index: 20, kind: input, shape index: {}]   ;;  %s3727_s21 = inlined_call_operand.hbm [shape: f32[4,4], index: 21, kind: input, shape index: {}]   ;;  %s3728_s22 = inlined_call_operand.<no memory space> [shape: f32[1,1], index: 22, kind: input, shape index: {}]   ;;  %s3729_s23 = inlined_call_operand.vmem [shape: f32[2,1], index: 23, kind: output, shape index: {}]  }
   0x1   :  { %3732 = sst [smem:[#allocation34_spill]] %s3706_s0  ;;  %v28_v0 = vstv %s3728_s22 }
   0x2   :  { %3733 = sst [smem:[#allocation35_spill]] %s3707_s1  ;;  %29 = vst [vmem:[#allocation2] sm:$0x1] %v28_v0 }
   0x3   :  { %3734 = sst [smem:[#allocation36_spill]] %s3708_s2 }
   0x4   :  { %3735 = sst [smem:[#allocation37_spill]] %s3709_s3 }
   0x5   :  { %3736 = sst [smem:[#allocation38_spill]] %s3710_s4 }
   0x6   :  { %3737 = sst [smem:[#allocation39_spill]] %s3711_s5 }
   0x7   :  { %3738 = sst [smem:[#allocation40_spill]] %s3712_s6 }
   0x8   :  { %3739 = sst [smem:[#allocation41_spill]] %s3713_s7 }
   0x9   :  { %30 = vsyncpa [#allocation4], 0 }
   0xa   :  { %31 = vsyncpa [#allocation6], 0 }
   0xb   :  { %32 = vsyncpa [#allocation9], 0 }
   0xc   :  { %33 = vsyncpa [#allocation12], 0 }
   0xd   :  { %34 = vsyncpa [#allocation15], 0 }
   0xe   :  { %35 = vsyncpa [#allocation18], 0 }
   0xf   :  { %36 = vsyncpa [#allocation21], 0 }
  0x10   :  { %37 = vsyncpa [#allocation24], 0  ;;  %s3012_s24 = smov [#allocation5]  }
  0x11   :  { %s59_s25 = sshll.u32 %s3012_s24, 4  ;;  %s60_s25 = int_to_ptr.vmem [resolvable:$true] %s59_s25 }
  0x12   :  { %s2704_s5 = scalar_lea.vmem %s60_s25, 1024  ;;  %p2709_p1 = scmp.lt.s32.totalorder %s60_s25, %s60_s25 }
  0x13   :  { %p2705_p0 = scmp.ne.s32.totalorder %s60_s25, %s2704_s5  ;;  %p2710_p2 = scmp.lt.s32.totalorder %s2704_s5, %s2704_s5 }
  0x15   :  { %p2711_p3 = por %p2710_p2, %p2709_p1 }
  0x17   :  { %p2712_p4 = pnand %p2711_p3, %p2705_p0 }
  0x19   :  { %2715 = shalt.err (!%p2712_p4)
}
  0x1a   :  { %s3013_s22 = smov 256   ;;  %s3014_s1 = smov 16  }
  0x1b   :  { %s3740_s6 = sld [smem:[#allocation37_spill]]  ;;  %s3015_s27 = smov [#allocation8]  }
  0x1c   :  { %s86_s7 = sshll.u32 %s3015_s27, 4  ;;  %s3016_s28 = smov [#allocation11]   ;;  %s87_s7 = int_to_ptr.vmem [resolvable:$true] %s86_s7 }
  0x1d   :  { %s106_s29 = sshll.u32 %s3016_s28, 4  ;;  %s2724_s3 = scalar_lea.vmem %s87_s7, 16  ;;  %s107_s29 = int_to_ptr.vmem [resolvable:$true] %s106_s29 }
  0x1e   :  { %p2725_p5 = scmp.ne.s32.totalorder %s87_s7, %s2724_s3  ;;  %s2728_s0 = scalar_lea.vmem %s87_s7, 32 }
  0x1f   :  { %p2729_p6 = scmp.lt.s32.totalorder %s87_s7, %s87_s7  ;;  %p2730_p7 = scmp.lt.s32.totalorder %s2728_s0, %s2724_s3 }
  0x21   :  { %65 = dma.hbm_to_vmem [thread:$0]  %s3740_s6, 1024, %s60_s25, [#allocation6], %s3013_s22, %s3013_s22, %s3014_s1  }
  0x22   :  { %p2731_p8 = por %p2730_p7, %p2729_p6 }
  0x24   :  { %p2732_p9 = pnand %p2731_p8, %p2725_p5 }
  0x26   :  { %2735 = shalt.err (!%p2732_p9)
}
  0x27   :  { %s3741_s24 = sld [smem:[#allocation40_spill]]  ;;  %s2744_s5 = scalar_lea.vmem %s107_s29, 16 }
  0x28   :  { %p2745_p10 = scmp.ne.s32.totalorder %s107_s29, %s2744_s5  ;;  %s2748_s25 = scalar_lea.vmem %s107_s29, 32 }
  0x29   :  { %p2749_p11 = scmp.lt.s32.totalorder %s107_s29, %s107_s29  ;;  %p2750_p12 = scmp.lt.s32.totalorder %s2748_s25, %s2744_s5 }
  0x2b   :  { %p2751_p13 = por %p2750_p12, %p2749_p11 }
  0x2d   :  { %89 = dma.hbm_to_vmem [thread:$0]  %s3741_s24, 16, %s87_s7, [#allocation9]  }
  0x2e   :  { %p2752_p0 = pnand %p2751_p13, %p2745_p10 }
  0x30   :  { %2755 = shalt.err (!%p2752_p0)
}
  0x31   :  { %109 = dma.hbm_to_vmem [thread:$0]  %s3714_s8, 16, %s107_s29, [#allocation12]  }
  0x32   :  { %s3017_s26 = smov [#allocation14]   ;;  %s3018_s6 = smov [#allocation17]  }
  0x33   :  { %s127_s2 = sshll.u32 %s3017_s26, 4  ;;  %s150_s27 = sshll.u32 %s3018_s6, 4  ;;  %s128_s2 = int_to_ptr.vmem [resolvable:$true] %s127_s2  ;;  %s151_s27 = int_to_ptr.vmem [resolvable:$true] %s150_s27 }
  0x34   :  { %s2764_s28 = scalar_lea.vmem %s128_s2, 4096  ;;  %p2769_p2 = scmp.lt.s32.totalorder %s128_s2, %s128_s2 }
  0x35   :  { %p2765_p1 = scmp.ne.s32.totalorder %s128_s2, %s2764_s28  ;;  %p2770_p3 = scmp.lt.s32.totalorder %s2764_s28, %s2764_s28 }
  0x37   :  { %p2771_p4 = por %p2770_p3, %p2769_p2 }
  0x39   :  { %p2772_p5 = pnand %p2771_p4, %p2765_p1 }
  0x3b   :  { %2775 = shalt.err (!%p2772_p5)
}
  0x3c   :  { %s3019_s7 = smov 64   ;;  %s3020_s3 = smov 4  }
  0x3d   :  { %133 = dma.hbm_to_vmem [thread:$0]  %s3717_s11, 4096, %s128_s2, [#allocation15], %s3019_s7, %s3019_s7, %s3020_s3  }
  0x3e   :  { %s2784_s8 = scalar_lea.vmem %s151_s27, 16  ;;  %s2788_s29 = scalar_lea.vmem %s151_s27, 32 }
  0x3f   :  { %p2785_p6 = scmp.ne.s32.totalorder %s151_s27, %s2784_s8  ;;  %p2789_p7 = scmp.lt.s32.totalorder %s151_s27, %s151_s27 }
  0x40   :  { %p2790_p8 = scmp.lt.s32.totalorder %s2788_s29, %s2784_s8 }
  0x42   :  { %p2791_p9 = por %p2790_p8, %p2789_p7 }
  0x44   :  { %p2792_p10 = pnand %p2791_p9, %p2785_p6 }
  0x46   :  { %2795 = shalt.err (!%p2792_p10)
}
  0x47   :  { %153 = dma.hbm_to_vmem [thread:$0]  %s3719_s13, 16, %s151_s27, [#allocation18]  }
  0x48   :  { %s3021_s5 = smov [#allocation20]   ;;  %s3022_s22 = smov [#allocation23]  }
  0x49   :  { %s172_s25 = sshll.u32 %s3021_s5, 4  ;;  %s198_s1 = sshll.u32 %s3022_s22, 4  ;;  %s173_s25 = int_to_ptr.vmem [resolvable:$true] %s172_s25  ;;  %s199_s1 = int_to_ptr.vmem [resolvable:$true] %s198_s1 }
  0x4a   :  { %s2804_s26 = scalar_lea.vmem %s173_s25, 16  ;;  %s2808_s11 = scalar_lea.vmem %s173_s25, 32 }
  0x4b   :  { %p2805_p11 = scmp.ne.s32.totalorder %s173_s25, %s2804_s26  ;;  %p2809_p12 = scmp.lt.s32.totalorder %s173_s25, %s173_s25 }
  0x4c   :  { %p2810_p13 = scmp.lt.s32.totalorder %s2808_s11, %s2804_s26 }
  0x4e   :  { %p2811_p0 = por %p2810_p13, %p2809_p12 }
  0x50   :  { %p2812_p1 = pnand %p2811_p0, %p2805_p11 }
  0x52   :  { %2815 = shalt.err (!%p2812_p1)
}
  0x53   :  { %175 = dma.hbm_to_vmem [thread:$0]  %s3722_s16, 16, %s173_s25, [#allocation21]  }
  0x54   :  { %s2824_s28 = scalar_lea.vmem %s199_s1, 64  ;;  %p2829_p3 = scmp.lt.s32.totalorder %s199_s1, %s199_s1 }
  0x55   :  { %p2825_p2 = scmp.ne.s32.totalorder %s199_s1, %s2824_s28  ;;  %p2830_p4 = scmp.lt.s32.totalorder %s2824_s28, %s2824_s28 }
  0x57   :  { %p2831_p5 = por %p2830_p4, %p2829_p3 }
  0x59   :  { %p2832_p6 = pnand %p2831_p5, %p2825_p2 }
  0x5b   :  { %2835 = shalt.err (!%p2832_p6)
}
  0x5c   :  { %201 = dma.hbm_to_vmem [thread:$0]  %s3726_s20, 64, %s199_s1, [#allocation24]  }
  0x5d   :  { %s3023_s0 = smov [#allocation3]  }
  0x5e   :  { %s47_s4 = sshll.u32 %s3023_s0, 4  ;;  %s48_s4 = int_to_ptr.vmem [resolvable:$true] %s47_s4 }
  0x5f   :  { %s2844_s8 = scalar_lea.vmem %s48_s4, 384  ;;  %p2849_p8 = scmp.lt.s32.totalorder %s48_s4, %s48_s4 }
  0x60   :  { %p2845_p7 = scmp.ne.s32.totalorder %s48_s4, %s2844_s8  ;;  %p2850_p9 = scmp.lt.s32.totalorder %s2844_s8, %s2844_s8 }
  0x62   :  { %p2851_p10 = por %p2850_p9, %p2849_p8 }
  0x64   :  { %p2852_p11 = pnand %p2851_p10, %p2845_p7 }
  0x66   :  { %2855 = shalt.err (!%p2852_p11)
}
  0x67   :  { %s3024_s16 = smov 128   ;;  %s3025_s29 = smov 8  }
  0x68   :  { %s3742_s5 = sld [smem:[#allocation36_spill]]  ;;  %s3026_s20 = smov [#allocation7]  }
  0x69   :  { %s73_s25 = sshll.u32 %s3026_s20, 4  ;;  %s3027_s22 = smov [#allocation10]   ;;  %s74_s25 = int_to_ptr.vmem [resolvable:$true] %s73_s25 }
  0x6a   :  { %s96_s1 = sshll.u32 %s3027_s22, 4  ;;  %s2864_s26 = scalar_lea.vmem %s74_s25, 1024  ;;  %s97_s1 = int_to_ptr.vmem [resolvable:$true] %s96_s1 }
  0x6b   :  { %p2865_p12 = scmp.ne.s32.totalorder %s74_s25, %s2864_s26  ;;  %p2869_p13 = scmp.lt.s32.totalorder %s74_s25, %s74_s25 }
  0x6c   :  { %p2870_p0 = scmp.lt.s32.totalorder %s2864_s26, %s2864_s26 }
  0x6e   :  { %53 = dma.hbm_to_vmem [thread:$0]  %s3742_s5, 384, %s48_s4, [#allocation4], %s3024_s16, %s3024_s16, %s3025_s29  }
  0x6f   :  { %p2871_p1 = por %p2870_p0, %p2869_p13 }
  0x71   :  { %p2872_p2 = pnand %p2871_p1, %p2865_p12 }
  0x73   :  { %2875 = shalt.err (!%p2872_p2)
}
  0x74   :  { %s3743_s6 = sld [smem:[#allocation39_spill]]  ;;  %s2884_s28 = scalar_lea.vmem %s97_s1, 16 }
  0x75   :  { %p2885_p3 = scmp.ne.s32.totalorder %s97_s1, %s2884_s28  ;;  %s2888_s13 = scalar_lea.vmem %s97_s1, 32 }
  0x76   :  { %p2889_p4 = scmp.lt.s32.totalorder %s97_s1, %s97_s1  ;;  %p2890_p5 = scmp.lt.s32.totalorder %s2888_s13, %s2884_s28 }
  0x78   :  { %p2891_p6 = por %p2890_p5, %p2889_p4 }
  0x7a   :  { %79 = dma.hbm_to_vmem [thread:$0]  %s3743_s6, 1024, %s74_s25, [#allocation6], %s3019_s7, %s3019_s7, %s3020_s3  }
  0x7b   :  { %p2892_p7 = pnand %p2891_p6, %p2885_p3 }
  0x7d   :  { %2895 = shalt.err (!%p2892_p7)
}
  0x7e   :  { %s3744_s4 = sld [smem:[#allocation41_spill]]  ;;  %s3028_s8 = smov [#allocation13]  }
  0x7f   :  { %s118_s30 = sshll.u32 %s3028_s8, 4  ;;  %s3029_s24 = smov [#allocation16]   ;;  %s119_s30 = int_to_ptr.vmem [resolvable:$true] %s118_s30 }
  0x80   :  { %s140_s5 = sshll.u32 %s3029_s24, 4  ;;  %s2904_s20 = scalar_lea.vmem %s119_s30, 64  ;;  %s141_s5 = int_to_ptr.vmem [resolvable:$true] %s140_s5 }
  0x81   :  { %p2905_p8 = scmp.ne.s32.totalorder %s119_s30, %s2904_s20  ;;  %p2909_p9 = scmp.lt.s32.totalorder %s119_s30, %s119_s30 }
  0x82   :  { %p2910_p10 = scmp.lt.s32.totalorder %s2904_s20, %s2904_s20 }
  0x84   :  { %99 = dma.hbm_to_vmem [thread:$0]  %s3744_s4, 16, %s97_s1, [#allocation9]  }
  0x85   :  { %p2911_p11 = por %p2910_p10, %p2909_p9 }
  0x87   :  { %p2912_p12 = pnand %p2911_p11, %p2905_p8 }
  0x89   :  { %2915 = shalt.err (!%p2912_p12)
}
  0x8a   :  { %121 = dma.hbm_to_vmem [thread:$0]  %s3716_s10, 64, %s119_s30, [#allocation12]  }
  0x8b   :  { %s2924_s25 = scalar_lea.vmem %s141_s5, 16  ;;  %s2928_s22 = scalar_lea.vmem %s141_s5, 32 }
  0x8c   :  { %p2925_p13 = scmp.ne.s32.totalorder %s141_s5, %s2924_s25  ;;  %p2929_p0 = scmp.lt.s32.totalorder %s141_s5, %s141_s5 }
  0x8d   :  { %p2930_p1 = scmp.lt.s32.totalorder %s2928_s22, %s2924_s25 }
  0x8f   :  { %p2931_p2 = por %p2930_p1, %p2929_p0 }
  0x91   :  { %p2932_p3 = pnand %p2931_p2, %p2925_p13 }
  0x93   :  { %2935 = shalt.err (!%p2932_p3)
}
  0x94   :  { %143 = dma.hbm_to_vmem [thread:$0]  %s3718_s12, 16, %s141_s5, [#allocation15]  }
  0x95   :  { %s3030_s11 = smov [#allocation19]   ;;  %s3031_s6 = smov [#allocation22]  }
  0x96   :  { %s160_s2 = sshll.u32 %s3030_s11, 4  ;;  %s183_s28 = sshll.u32 %s3031_s6, 4  ;;  %s161_s2 = int_to_ptr.vmem [resolvable:$true] %s160_s2  ;;  %s184_s28 = int_to_ptr.vmem [resolvable:$true] %s183_s28 }
  0x97   :  { %s2944_s13 = scalar_lea.vmem %s161_s2, 16  ;;  %s2948_s10 = scalar_lea.vmem %s161_s2, 32 }
  0x98   :  { %p2945_p4 = scmp.ne.s32.totalorder %s161_s2, %s2944_s13  ;;  %p2949_p5 = scmp.lt.s32.totalorder %s161_s2, %s161_s2 }
  0x99   :  { %p2950_p6 = scmp.lt.s32.totalorder %s2948_s10, %s2944_s13 }
  0x9b   :  { %p2951_p7 = por %p2950_p6, %p2949_p5 }
  0x9d   :  { %p2952_p8 = pnand %p2951_p7, %p2945_p4 }
  0x9f   :  { %2955 = shalt.err (!%p2952_p8)
}
  0xa0   :  { %163 = dma.hbm_to_vmem [thread:$0]  %s3720_s14, 16, %s161_s2, [#allocation18]  }
  0xa1   :  { %s2964_s4 = scalar_lea.vmem %s184_s28, 256  ;;  %p2969_p10 = scmp.lt.s32.totalorder %s184_s28, %s184_s28 }
  0xa2   :  { %p2965_p9 = scmp.ne.s32.totalorder %s184_s28, %s2964_s4  ;;  %p2970_p11 = scmp.lt.s32.totalorder %s2964_s4, %s2964_s4 }
  0xa4   :  { %p2971_p12 = por %p2970_p11, %p2969_p10 }
  0xa6   :  { %p2972_p13 = pnand %p2971_p12, %p2965_p9 }
  0xa8   :  { %2975 = shalt.err (!%p2972_p13)
}
  0xa9   :  { %189 = dma.hbm_to_vmem [thread:$0]  %s3724_s18, 256, %s184_s28, [#allocation21], %s3024_s16, %s3024_s16, %s3025_s29  }
  0xaa   :  { %s3032_s30 = smov [#allocation25]  }
  0xab   :  { %s208_s24 = sshll.u32 %s3032_s30, 4  ;;  %s209_s24 = int_to_ptr.vmem [resolvable:$true] %s208_s24 }
  0xac   :  { %s2984_s5 = scalar_lea.vmem %s209_s24, 64  ;;  %p2989_p1 = scmp.lt.s32.totalorder %s209_s24, %s209_s24 }
  0xad   :  { %p2985_p0 = scmp.ne.s32.totalorder %s209_s24, %s2984_s5  ;;  %p2990_p2 = scmp.lt.s32.totalorder %s2984_s5, %s2984_s5 }
  0xaf   :  { %p2991_p3 = por %p2990_p2, %p2989_p1 }
  0xb1   :  { %p2992_p4 = pnand %p2991_p3, %p2985_p0 }
  0xb3   :  { %2995 = shalt.err (!%p2992_p4)
}
  0xb4   :  { %211 = dma.hbm_to_vmem [thread:$0]  %s3727_s21, 64, %s209_s24, [#allocation24]  }
  0xb5   :  { %2996 = dma.done.wait [#allocation4], 384  }
  0xb6   :  { %2997 = vsyncadd [#allocation4], 4294966912 }
  0xb7   :  { %2998 = dma.done.wait [#allocation6], 2048  }
  0xb8   :  { %2999 = vsyncadd [#allocation6], 4294965248 }
  0xb9   :  { %3000 = dma.done.wait [#allocation9], 32  }
  0xba   :  { %3001 = vsyncadd [#allocation9], 4294967264 }
  0xbb   :  { %3002 = dma.done.wait [#allocation12], 80  }
  0xbc   :  { %3003 = vsyncadd [#allocation12], 4294967216 }
  0xbd   :  { %3004 = dma.done.wait [#allocation15], 4112  }
  0xbe   :  { %3005 = vsyncadd [#allocation15], 4294963184 }
  0xbf   :  { %3006 = dma.done.wait [#allocation18], 32  }
  0xc0   :  { %3007 = vsyncadd [#allocation18], 4294967264 }
  0xc1   :  { %3008 = dma.done.wait [#allocation21], 272  }
  0xc2   :  { %3009 = vsyncadd [#allocation21], 4294967024 }
  0xc3   :  { %3010 = dma.done.wait [#allocation24], 128  }
  0xc4   :  { %3011 = vsyncadd [#allocation24], 4294967168  ;;  %v3033_v1 = vmov 0   ;;  %s3745_s16 = sld [smem:[#allocation34_spill]]  ;;  %v2572_v10 = vld [vmem:[#allocation5 + $0x24] ss:$16 sps:$4 sm:$0xff]   ;;  %v262_v21 = vlaneseq }
  0xc5   :  { %2568 = vset.pattern.permute.xlu0 %v3033_v1  ;;  %475 = vmatprep.mubr.bf16.mxu1 %v3033_v1  ;;  %s3746_s3 = sld [smem:[#allocation35_spill]]  ;;  %v3034_v24 = vmov 1.0   ;;  %v2574_v26 = vld [vmem:[#allocation5 + $0x20] ss:$16 sps:$4 sm:$0xff]   ;;  %v2575_v27 = vld [vmem:[#allocation5 + $0x4] ss:$16 sps:$4 sm:$0xff]  }
  0xc6   :  { %455 = vmatprep.subr.bf16.mxu1 %v2572_v10  ;;  %v263_v22 = vand.u32 127, %v262_v21  ;;  %v2577_v28 = vld [vmem:[#allocation5] ss:$16 sps:$4 sm:$0xff]   ;;  %v2580_v29 = vld [vmem:[#allocation5 + $0x2c] ss:$16 sps:$4 sm:$0xff]   ;;  %vm439_vm2 = vcmask 261120  }
  0xc7   :  { %456 = vmatpush1.bf16.msra.mxu1 %v2574_v26  ;;  %v365_v30 = vld [vmem:[#allocation3] sm:$0xff]  ;;  %v548_v48 = vld [vmem:[%s3723_s17 + $0x78] sm:$0xff]  ;;  %v547_v53 = vld [vmem:[%s3723_s17 + $0x70] sm:$0xff]  ;;  %vm1839_vm3 = vcmask 1041409   ;;  %s3747_s8 = sld [smem:[#allocation38_spill]]  ;;  %vm634_vm4 = vcmask 130048  }
  0xc8   :  { %457 = vmatprep.subr.bf16.mxu1 %v2575_v27  ;;  %v2578_v37 = vld [vmem:[#allocation5 + $0x28] ss:$16 sps:$4 sm:$0xff]   ;;  %v2583_v40 = vld [vmem:[#allocation5 + $0xc] ss:$16 sps:$4 sm:$0xff]   ;;  %vm3036_vm5 = vmmov 0   ;;  %vm1913_vm6 = vcmask 25600  }
  0xc9   :  { %v2581_v45 = vld [vmem:[#allocation5 + $0x8] ss:$16 sps:$4 sm:$0xff]   ;;  %v546_v55 = vld [vmem:[%s3723_s17 + $0x68] sm:$0xff]  ;;  %v544_v59 = vld [vmem:[%s3723_s17 + $0x58] sm:$0xff]  ;;  %vm1993_vm7 = vcmask 1043456  }
  0xca   :  { %v260_v2 = vld [vmem:[%s3745_s16] sm:$0xff]  ;;  %v261_v5 = vld [vmem:[%s3745_s16 + $0x8] sm:$0xff]  ;;  %v543_v61 = vld [vmem:[%s3723_s17 + $0x50] sm:$0xff] }
  0xcb   :  { %v289_v3 = vld [vmem:[%s3746_s3 + $0x78] sm:$0xff]  ;;  %265 = vperm.xlu0 %2568, %v260_v2   ;;  %v288_v4 = vld [vmem:[%s3746_s3 + $0x70] sm:$0xff]  ;;  %v287_v6 = vld [vmem:[%s3746_s3 + $0x68] sm:$0xff]  ;;  %458 = vmatpush1.bf16.msra.mxu1 %v2577_v28 }
  0xcc   :  { %2345 = vmatprep.subr.mxu0 %v289_v3  ;;  %v286_v7 = vld [vmem:[%s3746_s3 + $0x60] sm:$0xff]  ;;  %v285_v8 = vld [vmem:[%s3746_s3 + $0x58] sm:$0xff]  ;;  %v284_v9 = vld [vmem:[%s3746_s3 + $0x50] sm:$0xff]  ;;  %498 = vmatprep.subr.bf16.mxu1 %v2580_v29 }
  0xcd   :  { %2346 = vmatpush3.msra.mxu0 %v289_v3  ;;  %v283_v11 = vld [vmem:[%s3746_s3 + $0x48] sm:$0xff]  ;;  %v282_v12 = vld [vmem:[%s3746_s3 + $0x40] sm:$0xff]  ;;  %v281_v13 = vld [vmem:[%s3746_s3 + $0x38] sm:$0xff] }
  0xce   :  { %2347 = vmatprep.subr.mxu0 %v288_v4  ;;  %v280_v14 = vld [vmem:[%s3746_s3 + $0x30] sm:$0xff]  ;;  %v279_v15 = vld [vmem:[%s3746_s3 + $0x28] sm:$0xff]  ;;  %v278_v16 = vld [vmem:[%s3746_s3 + $0x20] sm:$0xff] }
  0xcf   :  { %2348 = vmatpush3.msra.mxu0 %v288_v4  ;;  %268 = vperm.xlu0 %2568, %v261_v5   ;;  %v277_v17 = vld [vmem:[%s3746_s3 + $0x18] sm:$0xff]  ;;  %v276_v18 = vld [vmem:[%s3746_s3 + $0x10] sm:$0xff]  ;;  %v275_v19 = vld [vmem:[%s3746_s3 + $0x8] sm:$0xff] }
  0xd0   :  { %2349 = vmatprep.subr.mxu0 %v287_v6  ;;  %v274_v20 = vld [vmem:[%s3746_s3] sm:$0xff]  ;;  %v542_v62 = vld [vmem:[%s3723_s17 + $0x48] sm:$0xff]  ;;  %v540_v0 = vld [vmem:[%s3723_s17 + $0x38] sm:$0xff] }
  0xd1   :  { %2350 = vmatpush3.msra.mxu0 %v287_v6  ;;  %v545_v58 = vld [vmem:[%s3723_s17 + $0x60] sm:$0xff]  ;;  %v539_v2 = vld [vmem:[%s3723_s17 + $0x30] sm:$0xff]  ;;  %v538_v3 = vld [vmem:[%s3723_s17 + $0x28] sm:$0xff] }
  0xd2   :  { %2351 = vmatprep.subr.mxu0 %v286_v7  ;;  %v541_v63 = vld [vmem:[%s3723_s17 + $0x40] sm:$0xff]  ;;  %v536_v5 = vld [vmem:[%s3723_s17 + $0x18] sm:$0xff]  ;;  %v535_v6 = vld [vmem:[%s3723_s17 + $0x10] sm:$0xff] }
  0xd3   :  { %2352 = vmatpush3.msra.mxu0 %v286_v7  ;;  %v537_v4 = vld [vmem:[%s3723_s17 + $0x20] sm:$0xff]  ;;  %v534_v7 = vld [vmem:[%s3723_s17 + $0x8] sm:$0xff]  ;;  %v666_v27 = vld [vmem:[#allocation22 + $0x8] sm:$0xff] }
  0xd4   :  { %2353 = vmatprep.subr.mxu0 %v285_v8  ;;  %v665_v28 = vld [vmem:[#allocation22] sm:$0xff] }
  0xd5   :  { %2354 = vmatpush3.msra.mxu0 %v285_v8  ;;  %v533_v8 = vld [vmem:[%s3723_s17] sm:$0xff]  ;;  %v2584_v29 = vld [vmem:[#allocation7 + $0x38] sm:$0xff]  }
  0xd6   :  { %2355 = vmatprep.subr.mxu0 %v284_v9 }
  0xd7   :  { %2356 = vmatpush3.msra.mxu0 %v284_v9  ;;  %v3334_v9 = vshrl.u32 %v262_v21, 7 }
  0xd8   :  { %2357 = vmatprep.subr.mxu0 %v283_v11 }
  0xd9   :  { %2358 = vmatpush3.msra.mxu0 %v283_v11  ;;  %v381_v10 = vsub.s32 0, %v3334_v9  ;;  %v385_v11 = vsub.s32 1, %v3334_v9 }
  0xda   :  { %2359 = vmatprep.subr.mxu0 %v282_v12 }
  0xdb   :  { %2360 = vmatpush3.msra.mxu0 %v282_v12  ;;  %v3341_v12 = vld [vmem:[%s3747_s8] sm:$0xf] }
  0xdc   :  { %2361 = vmatprep.subr.mxu0 %v281_v13 }
  0xdd   :  { %2362 = vmatpush3.msra.mxu0 %v281_v13  ;;  %v382_v13 = vrot.slane %v3341_v12, %v381_v10 }
  0xde   :  { %2363 = vmatprep.subr.mxu0 %v280_v14 }
  0xdf   :  { %2364 = vmatpush3.msra.mxu0 %v280_v14  ;;  %v386_v14 = vrot.slane %v3341_v12, %v385_v11 }
  0xe0   :  { %2365 = vmatprep.subr.mxu0 %v279_v15 }
  0xe1   :  { %2366 = vmatpush3.msra.mxu0 %v279_v15 }
  0xe2   :  { %2367 = vmatprep.subr.mxu0 %v278_v16 }
  0xe3   :  { %2368 = vmatpush3.msra.mxu0 %v278_v16 }
  0xe4   :  { %2369 = vmatprep.subr.mxu0 %v277_v17 }
  0xe5   :  { %2370 = vmatpush3.msra.mxu0 %v277_v17 }
  0xe6   :  { %2371 = vmatprep.subr.mxu0 %v276_v18 }
  0xe7   :  { %2372 = vmatpush3.msra.mxu0 %v276_v18 }
  0xe8   :  { %2373 = vmatprep.subr.mxu0 %v275_v19 }
  0xe9   :  { %2374 = vmatpush3.msra.mxu0 %v275_v19 }
  0xea   :  { %2375 = vmatprep.subr.mxu0 %v274_v20 }
  0xeb   :  { %2376 = vmatpush3.msra.mxu0 %v274_v20 }
 0x146   :  { %v266_v23 = vpop.permute.xlu0 %265 }
 0x147   :  { %vm270_vm0 = vcmp.eq.s32.totalorder %v263_v22, %v266_v23 }
 0x148   :  { %2377 = vmatprep.mubr.msk.f32.mxu0 %vm270_vm0, %v3034_v24  ;;  %vm1989_vm0 = vcmask 31744  }
 0x14a   :  { %v269_v25 = vpop.permute.xlu0 %268 }
 0x14b   :  { %vm271_vm1 = vcmp.eq.s32.totalorder %v263_v22, %v269_v25 }
 0x14c   :  { %2378 = vmatmul.mubr.msk.f32.vlgmr.msra.gmra.mxu0 %vm271_vm1, %v3034_v24 }
 0x20c   :  { %v2379_v31 = vpop.f32.mrf.mxu0 }
 0x20d   :  { %v367_v32 = vadd.f32 %v2379_v31, %v365_v30  ;;  %v2585_v31 = vld [vmem:[#allocation7 + $0x30] sm:$0xff]  }
 0x20e   :  { %v356_v33 = vpop.f32.mrf.mxu0 }
 0x20f   :  { %v1817_v34 = vsel %vm439_vm2, %v367_v32, 0.0  ;;  %v366_v35 = vadd.f32 %v365_v30, %v356_v33  ;;  %v3035_v30 = vmov 0.0   ;;  %v2587_v33 = vld [vmem:[#allocation7 + $0x20] sm:$0xff]  }
 0x210   :  { %v1818_v36 = vrot.slane %v1817_v34, 4  ;;  %2428 = vmatprep.subr.bf16.mxu0 %v3035_v30  ;;  %2444 = vmatprep.mubr.msk.bf16.mxu0 %vm3036_vm5, %v3035_v30 }
 0x211   :  { %v368_v38 = vpack.c.bf16 %v367_v32, %v366_v35  ;;  %v1810_v39 = vsel %vm439_vm2, %v366_v35, 0.0  ;;  %2429 = vmatpush3.bf16.msra.mxu0 %v2584_v29  ;;  %v2586_v32 = vld [vmem:[#allocation7 + $0x28] sm:$0xff]  }
 0x212   :  { %v1819_v41 = vadd.f32 %v1818_v36, %v1817_v34  ;;  %v1811_v42 = vrot.slane %v1810_v39, 4  ;;  %2430 = vmatprep.subr.bf16.mxu0 %v3035_v30  ;;  %v2588_v34 = vld [vmem:[#allocation7 + $0x18] sm:$0xff]   ;;  %v3457_v29 = vld [vmem:[%s3725_s19 + $0x20] sm:$0xff] }
 0x213   :  { %2108 = vmatmul.mubr.msk.bf16.vlgmr.msra.gmra.mxu1 %vm439_vm2, %v368_v38 }
 0x214   :  { %v1820_v43 = vrot.slane %v1819_v41, 2  ;;  %v1812_v44 = vadd.f32 %v1811_v42, %v1810_v39  ;;  %499 = vmatpush1.bf16.msra.mxu1 %v2578_v37  ;;  %518 = vmatprep.mubr.bf16.mxu1 %v3033_v1 }
 0x215   :  { %500 = vmatprep.subr.bf16.mxu1 %v2583_v40  ;;  %2431 = vmatpush3.bf16.msra.mxu0 %v2585_v31  ;;  %v389_v31 = vsub.s32 2, %v3334_v9 }
 0x216   :  { %v1821_v46 = vadd.f32 %v1820_v43, %v1819_v41  ;;  %v1813_v47 = vrot.slane %v1812_v44, 2  ;;  %2432 = vmatprep.subr.bf16.mxu0 %v3035_v30 }
 0x218   :  { %v1822_v49 = vrot.slane %v1821_v46, 1  ;;  %v1814_v50 = vadd.f32 %v1813_v47, %v1812_v44  ;;  %501 = vmatpush1.bf16.msra.mxu1 %v2581_v45 }
 0x219   :  { %2380 = vmatprep.subr.mxu1 %v548_v48  ;;  %2433 = vmatpush3.bf16.msra.mxu0 %v2586_v32  ;;  %v390_v32 = vrot.slane %v3341_v12, %v389_v31 }
 0x21a   :  { %v1823_v51 = vadd.f32 %v1822_v49, %v1821_v46  ;;  %v1815_v52 = vrot.slane %v1814_v50, 1  ;;  %2434 = vmatprep.subr.bf16.mxu0 %v3035_v30 }
 0x21b   :  { %2109 = vmatmul.mubr.msk.bf16.vlgmr.msra.gmra.mxu1 %vm439_vm2, %v368_v38 }
 0x21c   :  { %v1816_v54 = vadd.f32 %v1815_v52, %v1814_v50  ;;  %2381 = vmatpush3.msra.mxu1 %v548_v48  ;;  %v1825_v56 = vmul.f32 0.125, %v1823_v51 }
 0x21d   :  { %2382 = vmatprep.subr.mxu1 %v547_v53  ;;  %2435 = vmatpush3.bf16.msra.mxu0 %v2587_v33 }
 0x21e   :  { %v1824_v57 = vmul.f32 0.125, %v1816_v54  ;;  %2383 = vmatpush3.msra.mxu1 %v547_v53  ;;  %2436 = vmatprep.subr.bf16.mxu0 %v3035_v30 }
 0x21f   :  { %2384 = vmatprep.subr.mxu1 %v546_v55 }
 0x220   :  { %2385 = vmatpush3.msra.mxu1 %v546_v55  ;;  %v3298_v60 = vsel %vm1839_vm3, %v1825_v56, %v1824_v57 }
 0x221   :  { %2386 = vmatprep.subr.mxu1 %v545_v58  ;;  %2437 = vmatpush3.bf16.msra.mxu0 %v2588_v34 }
 0x222   :  { %2387 = vmatpush3.msra.mxu1 %v545_v58  ;;  %2438 = vmatprep.subr.bf16.mxu0 %v3035_v30 }
 0x223   :  { %2388 = vmatprep.subr.mxu1 %v544_v59 }
 0x224   :  { %2389 = vmatpush3.msra.mxu1 %v544_v59 }
 0x225   :  { %2390 = vmatprep.subr.mxu1 %v543_v61 }
 0x226   :  { %2391 = vmatpush3.msra.mxu1 %v543_v61 }
 0x227   :  { %2392 = vmatprep.subr.mxu1 %v542_v62 }
 0x228   :  { %2393 = vmatpush3.msra.mxu1 %v542_v62 }
 0x229   :  { %2394 = vmatprep.subr.mxu1 %v541_v63 }
 0x22a   :  { %2395 = vmatpush3.msra.mxu1 %v541_v63 }
 0x22b   :  { %2396 = vmatprep.subr.mxu1 %v540_v0 }
 0x22c   :  { %2397 = vmatpush3.msra.mxu1 %v540_v0 }
 0x22d   :  { %2398 = vmatprep.subr.mxu1 %v539_v2 }
 0x22e   :  { %2399 = vmatpush3.msra.mxu1 %v539_v2 }
 0x22f   :  { %2400 = vmatprep.subr.mxu1 %v538_v3 }
 0x230   :  { %2401 = vmatpush3.msra.mxu1 %v538_v3 }
 0x231   :  { %2402 = vmatprep.subr.mxu1 %v537_v4 }
 0x232   :  { %2403 = vmatpush3.msra.mxu1 %v537_v4 }
 0x233   :  { %2404 = vmatprep.subr.mxu1 %v536_v5 }
 0x234   :  { %2405 = vmatpush3.msra.mxu1 %v536_v5 }
 0x235   :  { %2406 = vmatprep.subr.mxu1 %v535_v6 }
 0x236   :  { %2407 = vmatpush3.msra.mxu1 %v535_v6 }
 0x237   :  { %2408 = vmatprep.subr.mxu1 %v534_v7 }
 0x238   :  { %2409 = vmatpush3.msra.mxu1 %v534_v7 }
 0x239   :  { %2410 = vmatprep.subr.mxu1 %v533_v8 }
 0x23a   :  { %2411 = vmatpush3.msra.mxu1 %v533_v8 }
 0x23b   :  { %2418 = vmatprep.subr.mxu1 %v666_v27 }
 0x2d3   :  { %v477_v15 = vpop.f32.mrf.mxu1 }
 0x2d4   :  { %v478_v17 = vadd.f32 %v477_v15, %v382_v13  ;;  %v2589_v15 = vld [vmem:[#allocation7 + $0x10] sm:$0xff]  }
 0x2d5   :  { %v479_v16 = vpop.f32.mrf.mxu1  ;;  %2439 = vmatpush3.bf16.msra.mxu0 %v2589_v15  ;;  %v2604_v15 = vld [vmem:[%s3715_s9 + $0xa0] ss:$16 sps:$4 sm:$0xff]  }
 0x2d6   :  { %v480_v18 = vadd.f32 %v479_v16, %v386_v14  ;;  %2440 = vmatprep.subr.bf16.mxu0 %v3035_v30  ;;  %v2590_v16 = vld [vmem:[#allocation7 + $0x8] sm:$0xff]  }
 0x2d7   :  { %v481_v19 = vpop.f32.mrf.mxu1 }
 0x2d8   :  { %v529_v20 = vmul.f32 %v480_v18, %v478_v17  ;;  %v482_v21 = vadd.f32 %v481_v19, %v382_v13  ;;  %v3387_v19 = vld [vmem:[%s3725_s19 + $0x70] sm:$0xff] }
 0x2d9   :  { %v483_v22 = vpop.f32.mrf.mxu1  ;;  %2441 = vmatpush3.bf16.msra.mxu0 %v2590_v16  ;;  %v2607_v16 = vld [vmem:[%s3715_s9 + $0xa8] ss:$16 sps:$4 sm:$0xff]  }
 0x2da   :  { %v484_v23 = vadd.f32 %v483_v22, %v386_v14  ;;  %2412 = vmatprep.mubr.f32.mxu1 %v529_v20  ;;  %v531_v25 = vmul.f32 %v482_v21, %v480_v18  ;;  %2442 = vmatprep.subr.bf16.mxu0 %v3035_v30  ;;  %v3382_v18 = vld [vmem:[%s3725_s19 + $0x78] sm:$0xff]  ;;  %v3394_v20 = vld [vmem:[%s3725_s19 + $0x68] sm:$0xff] }
 0x2db   :  { %v3355_v35 = vpop.f32.mrf.mxu1  ;;  %v3408_v22 = vld [vmem:[%s3725_s19 + $0x58] sm:$0xff] }
 0x2dc   :  { %v530_v24 = vmul.f32 %v484_v23, %v478_v17  ;;  %v532_v26 = vmul.f32 %v484_v23, %v482_v21  ;;  %v2591_v17 = vld [vmem:[#allocation7] sm:$0xff]   ;;  %v3415_v23 = vld [vmem:[%s3725_s19 + $0x50] sm:$0xff]  ;;  %v521_v34 = vadd.f32 %v3355_v35, %v390_v32 }
 0x2dd   :  { %v3357_v36 = vpop.f32.mrf.mxu1  ;;  %2443 = vmatpush3.bf16.msra.mxu0 %v2591_v17  ;;  %v3401_v21 = vld [vmem:[%s3725_s19 + $0x60] sm:$0xff]  ;;  %v3480_v35 = vld [vmem:[%s3725_s19 + $0x10] sm:$0xff] }
 0x2de   :  { %2413 = vmatmul.mubr.f32.vlgmr.msra.gmra.mxu1 %v530_v24  ;;  %v3422_v24 = vld [vmem:[%s3725_s19 + $0x48] sm:$0xff]  ;;  %v2610_v17 = vld [vmem:[%s3715_s9 + $0x80] ss:$16 sps:$4 sm:$0xff]  }
 0x2df   :  { %2415 = vmatprep.mubr.f32.mxu1 %v531_v25  ;;  %2419 = vmatpush3.msra.mxu1 %v666_v27  ;;  %v3359_v37 = vpop.f32.mrf.mxu1  ;;  %v3429_v25 = vld [vmem:[%s3725_s19 + $0x40] sm:$0xff]  ;;  %v3443_v27 = vld [vmem:[%s3725_s19 + $0x30] sm:$0xff] }
 0x2e0   :  { %2420 = vmatprep.subr.mxu1 %v665_v28 }
 0x2e1   :  { %2421 = vmatpush3.msra.mxu1 %v665_v28  ;;  %v3361_v38 = vpop.f32.mrf.mxu1  ;;  %v3450_v28 = vld [vmem:[%s3725_s19 + $0x28] sm:$0xff] }
 0x2e2   :  { %2416 = vmatmul.mubr.f32.gmra.mxu1 %v532_v26  ;;  %2448 = vmatprep.subr.mxu1 %v3382_v18  ;;  %v3436_v26 = vld [vmem:[%s3725_s19 + $0x38] sm:$0xff] }
 0x39e   :  { %v2414_v39 = vpop.f32.mrf.mxu1 }
 0x39f   :  { %v636_v41 = vsel %vm634_vm4, %v2414_v39, -inf }
 0x3a0   :  { %v615_v40 = vpop.f32.mrf.mxu1 }
 0x3a1   :  { %v635_v42 = vsel %vm634_vm4, %v615_v40, -inf }
 0x3a2   :  { %v637_v43 = vmax.f32 %v635_v42, %v636_v41  ;;  %v2417_v44 = vpop.f32.mrf.mxu1 }
 0x3a3   :  { %v639_v48 = vsel %vm634_vm4, %v2417_v44, -inf }
 0x3a4   :  { %v641_v45 = vsub.f32 %v615_v40, %v637_v43  ;;  %v642_v46 = vsub.f32 %v2414_v39, %v637_v43  ;;  %v625_v47 = vpop.f32.mrf.mxu1  ;;  %v525_v39 = vadd.f32 %v3359_v37, %v390_v32  ;;  %v3487_v37 = vld [vmem:[%s3725_s19 + $0x8] sm:$0xff]  ;;  %v2612_v32 = vld [vmem:[%s3715_s9 + $0x84] ss:$16 sps:$4 sm:$0xff]  }
 0x3a5   :  { %v638_v49 = vsel %vm634_vm4, %v625_v47, -inf }
 0x3a6   :  { %v645_v50 = vmul.f32 1.442695, %v641_v45  ;;  %v647_v51 = vmul.f32 1.442695, %v642_v46  ;;  %v640_v52 = vmax.f32 %v638_v49, %v639_v48 }
 0x3a8   :  { %2672 = vpow2.f32 %v645_v50  ;;  %v643_v53 = vsub.f32 %v625_v47, %v640_v52  ;;  %v644_v54 = vsub.f32 %v2417_v44, %v640_v52  ;;  %v3473_v50 = vld [vmem:[%s3725_s19 + $0x18] sm:$0xff]  ;;  %v393_v52 = vsub.s32 3, %v3334_v9 }
 0x3a9   :  { %2674 = vpow2.f32 %v647_v51  ;;  %v3494_v51 = vld [vmem:[%s3725_s19] sm:$0xff] }
 0x3aa   :  { %v649_v55 = vmul.f32 1.442695, %v643_v53  ;;  %v651_v56 = vmul.f32 1.442695, %v644_v54  ;;  %v394_v53 = vrot.slane %v3341_v12, %v393_v52  ;;  %v2114_v54 = vld [vmem:[#allocation8] ss:$0 sm:$0xff] }
 0x3ac   :  { %2676 = vpow2.f32 %v649_v55 }
 0x3ad   :  { %2678 = vpow2.f32 %v651_v56  ;;  %v523_v56 = vadd.f32 %v3357_v36, %v394_v53 }
 0x3b5   :  { %v2673_v57 = vpop.eup %2672 }
 0x3b6   :  { %v2675_v58 = vpop.eup %2674  ;;  %v653_v59 = vsel %vm634_vm4, %v2673_v57, 0.0 }
 0x3b7   :  { %v654_v61 = vsel %vm634_vm4, %v2675_v58, 0.0 }
 0x3b8   :  { %v655_v62 = vadd.f32 %v654_v61, %v653_v59 }
 0x3b9   :  { %v2677_v63 = vpop.eup %2676 }
 0x3ba   :  { %v2679_v0 = vpop.eup %2678  ;;  %2680 = vrcp.f32 %v655_v62  ;;  %v656_v2 = vsel %vm634_vm4, %v2677_v63, 0.0  ;;  %v527_v62 = vadd.f32 %v3361_v38, %v394_v53  ;;  %v2594_v38 = vld [vmem:[%s3715_s9 + $0xe4] ss:$16 sps:$4 sm:$0xff]   ;;  %v2631_v53 = vld [vmem:[%s3715_s9 + $0x28] ss:$16 sps:$4 sm:$0xff]  }
 0x3bb   :  { %v657_v3 = vsel %vm634_vm4, %v2679_v0, 0.0  ;;  %1233 = vmatprep.subr.bf16.mxu0 %v2594_v38 }
 0x3bc   :  { %v658_v4 = vadd.f32 %v657_v3, %v656_v2  ;;  %v2597_v3 = vld [vmem:[%s3715_s9 + $0xec] ss:$16 sps:$4 sm:$0xff]  }
 0x3be   :  { %2682 = vrcp.f32 %v658_v4  ;;  %v2592_v4 = vld [vmem:[%s3715_s9 + $0xe0] ss:$16 sps:$4 sm:$0xff]  }
 0x3c7   :  { %v2681_v5 = vpop.eup %2680 }
 0x3c8   :  { %v661_v6 = vmul.f32 %v2681_v5, %v2673_v57  ;;  %v662_v7 = vmul.f32 %v2681_v5, %v2675_v58  ;;  %v2595_v5 = vld [vmem:[%s3715_s9 + $0xe8] ss:$16 sps:$4 sm:$0xff]  }
 0x3ca   :  { %2422 = vmatprep.mubr.msk.f32.mxu1 %vm634_vm4, %v661_v6  ;;  %v2603_v6 = vld [vmem:[%s3715_s9 + $0xcc] ss:$16 sps:$4 sm:$0xff]  }
 0x3cb   :  { %v2683_v8 = vpop.eup %2682  ;;  %2423 = vmatmul.mubr.msk.f32.vlgmr.msra.gmra.mxu1 %vm634_vm4, %v662_v7  ;;  %v2598_v7 = vld [vmem:[%s3715_s9 + $0xc0] ss:$16 sps:$4 sm:$0xff]  }
 0x3cc   :  { %v663_v13 = vmul.f32 %v2683_v8, %v2677_v63  ;;  %v664_v14 = vmul.f32 %v2683_v8, %v2679_v0  ;;  %2449 = vmatpush3.msra.mxu1 %v3382_v18  ;;  %v2601_v8 = vld [vmem:[%s3715_s9 + $0xc8] ss:$16 sps:$4 sm:$0xff]  }
 0x3cd   :  { %2450 = vmatprep.subr.mxu1 %v3387_v19 }
 0x3ce   :  { %2425 = vmatprep.mubr.msk.f32.mxu1 %vm634_vm4, %v663_v13  ;;  %2451 = vmatpush3.msra.mxu1 %v3387_v19  ;;  %v2606_v13 = vld [vmem:[%s3715_s9 + $0xa4] ss:$16 sps:$4 sm:$0xff]  }
 0x3cf   :  { %2426 = vmatmul.mubr.msk.f32.gmra.mxu1 %vm634_vm4, %v664_v14  ;;  %2452 = vmatprep.subr.mxu1 %v3394_v20  ;;  %v2609_v14 = vld [vmem:[%s3715_s9 + $0xac] ss:$16 sps:$4 sm:$0xff]   ;;  %vm2084_vm4 = vcmask 1024  }
 0x3d0   :  { %2453 = vmatpush3.msra.mxu1 %v3394_v20 }
 0x3d1   :  { %2454 = vmatprep.subr.mxu1 %v3401_v21 }
 0x3d2   :  { %2455 = vmatpush3.msra.mxu1 %v3401_v21 }
 0x3d3   :  { %2456 = vmatprep.subr.mxu1 %v3408_v22 }
 0x3d4   :  { %2457 = vmatpush3.msra.mxu1 %v3408_v22 }
 0x3d5   :  { %2458 = vmatprep.subr.mxu1 %v3415_v23 }
 0x3d6   :  { %2459 = vmatpush3.msra.mxu1 %v3415_v23 }
 0x3d7   :  { %2460 = vmatprep.subr.mxu1 %v3422_v24 }
 0x3d8   :  { %2461 = vmatpush3.msra.mxu1 %v3422_v24 }
 0x3d9   :  { %2462 = vmatprep.subr.mxu1 %v3429_v25 }
 0x3da   :  { %2463 = vmatpush3.msra.mxu1 %v3429_v25 }
 0x3db   :  { %2464 = vmatprep.subr.mxu1 %v3436_v26 }
 0x3dc   :  { %2465 = vmatpush3.msra.mxu1 %v3436_v26 }
 0x3dd   :  { %2466 = vmatprep.subr.mxu1 %v3443_v27 }
 0x3de   :  { %2467 = vmatpush3.msra.mxu1 %v3443_v27 }
 0x3df   :  { %2468 = vmatprep.subr.mxu1 %v3450_v28 }
 0x3e0   :  { %2469 = vmatpush3.msra.mxu1 %v3450_v28 }
 0x3e1   :  { %2470 = vmatprep.subr.mxu1 %v3457_v29 }
 0x3e2   :  { %2471 = vmatpush3.msra.mxu1 %v3457_v29 }
 0x3e3   :  { %2472 = vmatprep.subr.mxu1 %v3473_v50 }
 0x3e4   :  { %2473 = vmatpush3.msra.mxu1 %v3473_v50 }
 0x3e5   :  { %2474 = vmatprep.subr.mxu1 %v3480_v35 }
 0x3e6   :  { %2475 = vmatpush3.msra.mxu1 %v3480_v35 }
 0x3e7   :  { %2476 = vmatprep.subr.mxu1 %v3487_v37 }
 0x3e8   :  { %2477 = vmatpush3.msra.mxu1 %v3487_v37 }
 0x3e9   :  { %2478 = vmatprep.subr.mxu1 %v3494_v51 }
 0x3ea   :  { %2479 = vmatpush3.msra.mxu1 %v3494_v51 }
 0x3eb   :  { %1276 = vmatprep.subr.bf16.mxu1 %v2597_v3 }
 0x48b   :  { %v2424_v33 = vpop.f32.mrf.mxu1 }
 0x48c   :  { %v765_v41 = vmul.f32 %v2424_v33, %v525_v39  ;;  %v2613_v33 = vld [vmem:[%s3715_s9 + $0x88] ss:$16 sps:$4 sm:$0xff]  }
 0x48d   :  { %v745_v40 = vpop.f32.mrf.mxu1 }
 0x48e   :  { %v764_v42 = vmul.f32 %v745_v40, %v521_v34  ;;  %v2621_v40 = vld [vmem:[%s3715_s9 + $0x6c] ss:$16 sps:$4 sm:$0xff]  }
 0x48f   :  { %v2427_v43 = vpop.f32.mrf.mxu1 }
 0x490   :  { %v768_v44 = vadd.f32 %v765_v41, %v764_v42  ;;  %v767_v46 = vmul.f32 %v2427_v43, %v525_v39  ;;  %v2618_v39 = vld [vmem:[%s3715_s9 + $0x64] ss:$16 sps:$4 sm:$0xff]   ;;  %v2616_v41 = vld [vmem:[%s3715_s9 + $0x60] ss:$16 sps:$4 sm:$0xff]   ;;  %v2619_v42 = vld [vmem:[%s3715_s9 + $0x68] ss:$16 sps:$4 sm:$0xff]  }
 0x491   :  { %v755_v45 = vpop.f32.mrf.mxu1  ;;  %v2624_v43 = vld [vmem:[%s3715_s9 + $0x44] ss:$16 sps:$4 sm:$0xff]  }
 0x492   :  { %v766_v47 = vmul.f32 %v755_v45, %v521_v34  ;;  %v2615_v34 = vld [vmem:[%s3715_s9 + $0x8c] ss:$16 sps:$4 sm:$0xff]   ;;  %v2622_v45 = vld [vmem:[%s3715_s9 + $0x40] ss:$16 sps:$4 sm:$0xff]  }
 0x494   :  { %v769_v48 = vadd.f32 %v767_v46, %v766_v47  ;;  %v2625_v46 = vld [vmem:[%s3715_s9 + $0x48] ss:$16 sps:$4 sm:$0xff]   ;;  %v2630_v47 = vld [vmem:[%s3715_s9 + $0x24] ss:$16 sps:$4 sm:$0xff]  }
 0x496   :  { %v770_v49 = vpack.c.bf16 %v769_v48, %v768_v44  ;;  %v2627_v44 = vld [vmem:[%s3715_s9 + $0x4c] ss:$16 sps:$4 sm:$0xff]  }
 0x497   :  { %v2633_v48 = vld [vmem:[%s3715_s9 + $0x2c] ss:$16 sps:$4 sm:$0xff]  }
 0x498   :  { %2445 = vmatmul.mubr.bf16.vlgmr.msra.gmra.mxu0 %v770_v49  ;;  %v2628_v49 = vld [vmem:[%s3715_s9 + $0x20] ss:$16 sps:$4 sm:$0xff]  }
 0x499   :  { %1265 = vmatprep.mubr.bf16.mxu0 %v3033_v1  ;;  %1234 = vmatpush1.bf16.msra.mxu0 %v2592_v4 }
 0x558   :  { %v876_v55 = vpop.f32.mrf.mxu0 }
 0x559   :  { %v877_v57 = vadd.f32 %v2114_v54, %v876_v55  ;;  %v2639_v55 = vld [vmem:[%s3715_s9 + $0xc] ss:$16 sps:$4 sm:$0xff]  }
 0x55a   :  { %v2446_v58 = vpop.f32.mrf.mxu0 }
 0x55b   :  { %v3503_v59 = vadd.f32 %v877_v57, %v523_v56  ;;  %v2634_v56 = vld [vmem:[%s3715_s9] ss:$16 sps:$4 sm:$0xff]   ;;  %v2637_v57 = vld [vmem:[%s3715_s9 + $0x8] ss:$16 sps:$4 sm:$0xff]  }
 0x55c   :  { %v879_v61 = vpop.f32.mrf.mxu0  ;;  %v2640_v58 = vld [vmem:[#allocation14 + $0xf8] sm:$0xff]  }
 0x55d   :  { %v880_v63 = vadd.f32 %v2114_v54, %v879_v61  ;;  %2480 = vmatprep.mubr.f32.mxu1 %v3503_v59  ;;  %v903_v12 = vmul.f32 %v3503_v59, %v3503_v59  ;;  %v2636_v54 = vld [vmem:[%s3715_s9 + $0x4] ss:$16 sps:$4 sm:$0xff]   ;;  %v2641_v61 = vld [vmem:[#allocation14 + $0x78] sm:$0xff]  }
 0x55e   :  { %v2447_v0 = vpop.f32.mrf.mxu0 }
 0x55f   :  { %v3507_v2 = vadd.f32 %v880_v63, %v527_v62 }
 0x561   :  { %2481 = vmatmul.mubr.f32.vlgmr.msra.gmra.mxu1 %v3507_v2  ;;  %v904_v36 = vmul.f32 %v3507_v2, %v3507_v2 }
 0x562   :  { %2483 = vmatprep.mubr.f32.mxu1 %v903_v12  ;;  %1277 = vmatpush1.bf16.msra.mxu1 %v2595_v5 }
 0x563   :  { %1278 = vmatprep.subr.bf16.mxu1 %v2603_v6 }
 0x565   :  { %2484 = vmatmul.mubr.f32.gmra.mxu1 %v904_v36 }
 0x566   :  { %1308 = vmatprep.mubr.bf16.mxu1 %v3033_v1  ;;  %v2600_v1 = vld [vmem:[%s3715_s9 + $0xc4] ss:$16 sps:$4 sm:$0xff]   ;;  %1279 = vmatpush1.bf16.msra.mxu1 %v2601_v8  ;;  %v2123_v8 = vld [vmem:[#allocation10] ss:$0 sm:$0xff] }
 0x567   :  { %1235 = vmatprep.subr.bf16.mxu0 %v2600_v1  ;;  %1280 = vmatprep.subr.bf16.mxu1 %v2609_v14 }
 0x568   :  { %1236 = vmatpush1.bf16.msra.mxu0 %v2598_v7 }
 0x569   :  { %1237 = vmatprep.subr.bf16.mxu0 %v2606_v13 }
 0x56a   :  { %1281 = vmatpush1.bf16.msra.mxu1 %v2607_v16 }
 0x56b   :  { %1282 = vmatprep.subr.bf16.mxu1 %v2615_v34 }
 0x56c   :  { %1238 = vmatpush1.bf16.msra.mxu0 %v2604_v15 }
 0x56d   :  { %1239 = vmatprep.subr.bf16.mxu0 %v2612_v32  ;;  %v2124_v32 = vld [vmem:[#allocation11] ss:$0 sm:$0xff] }
 0x56e   :  { %1283 = vmatpush1.bf16.msra.mxu1 %v2613_v33 }
 0x56f   :  { %1284 = vmatprep.subr.bf16.mxu1 %v2621_v40  ;;  %v2642_v40 = vld [vmem:[#allocation14 + $0xb8] sm:$0xff]  }
 0x570   :  { %1240 = vmatpush1.bf16.msra.mxu0 %v2610_v17 }
 0x571   :  { %1241 = vmatprep.subr.bf16.mxu0 %v2618_v39 }
 0x572   :  { %1285 = vmatpush1.bf16.msra.mxu1 %v2619_v42 }
 0x573   :  { %1286 = vmatprep.subr.bf16.mxu1 %v2627_v44  ;;  %v2647_v44 = vld [vmem:[#allocation14 + $0x30] sm:$0xff]  }
 0x574   :  { %1242 = vmatpush1.bf16.msra.mxu0 %v2616_v41  ;;  %v2643_v41 = vld [vmem:[#allocation14 + $0x38] sm:$0xff]  }
 0x575   :  { %1243 = vmatprep.subr.bf16.mxu0 %v2624_v43  ;;  %v2645_v43 = vld [vmem:[#allocation14 + $0x70] sm:$0xff]  }
 0x576   :  { %1287 = vmatpush1.bf16.msra.mxu1 %v2625_v46  ;;  %v2649_v46 = vld [vmem:[#allocation14 + $0x68] sm:$0xff]  }
 0x577   :  { %1288 = vmatprep.subr.bf16.mxu1 %v2633_v48  ;;  %v2651_v48 = vld [vmem:[#allocation14 + $0x28] sm:$0xff]  }
 0x578   :  { %1244 = vmatpush1.bf16.msra.mxu0 %v2622_v45  ;;  %v2648_v45 = vld [vmem:[#allocation14 + $0xe8] sm:$0xff]  }
 0x579   :  { %1245 = vmatprep.subr.bf16.mxu0 %v2630_v47  ;;  %v2650_v47 = vld [vmem:[#allocation14 + $0xa8] sm:$0xff]  }
 0x57a   :  { %1289 = vmatpush1.bf16.msra.mxu1 %v2631_v53  ;;  %v2653_v53 = vld [vmem:[#allocation14 + $0x60] sm:$0xff]  }
 0x57b   :  { %1290 = vmatprep.subr.bf16.mxu1 %v2639_v55  ;;  %v2655_v55 = vld [vmem:[#allocation14 + $0x20] sm:$0xff]  }
 0x57c   :  { %1246 = vmatpush1.bf16.msra.mxu0 %v2628_v49  ;;  %v2652_v49 = vld [vmem:[#allocation14 + $0xe0] sm:$0xff]  }
 0x57d   :  { %1247 = vmatprep.subr.bf16.mxu0 %v2636_v54  ;;  %v2654_v54 = vld [vmem:[#allocation14 + $0xa0] sm:$0xff]  }
 0x57e   :  { %1291 = vmatpush1.bf16.msra.mxu1 %v2637_v57  ;;  %v2657_v57 = vld [vmem:[#allocation14 + $0x58] sm:$0xff]  }
 0x57f   :  { %2296 = vmatprep.subr.bf16.mxu1 %v2640_v58  ;;  %v2658_v58 = vld [vmem:[#allocation14 + $0x98] sm:$0xff]  }
 0x580   :  { %1248 = vmatpush1.bf16.msra.mxu0 %v2634_v56  ;;  %v2656_v56 = vld [vmem:[#allocation14 + $0xd8] sm:$0xff]  }
 0x581   :  { %2274 = vmatprep.subr.bf16.mxu0 %v2641_v61  ;;  %v2659_v61 = vld [vmem:[#allocation14 + $0x18] sm:$0xff]  }
 0x621   :  { %v2482_v62 = vpop.f32.mrf.mxu1 }
 0x622   :  { %v991_v0 = vmul.f32 %v2482_v62, %v2482_v62  ;;  %v995_v6 = vsub.f32 %v3507_v2, %v2482_v62  ;;  %v2644_v2 = vld [vmem:[#allocation14 + $0xf0] sm:$0xff]  }
 0x623   :  { %v971_v63 = vpop.f32.mrf.mxu1  ;;  %v2660_v62 = vld [vmem:[#allocation14 + $0xd0] sm:$0xff]  }
 0x624   :  { %v990_v36 = vmul.f32 %v971_v63, %v971_v63  ;;  %v994_v13 = vsub.f32 %v3503_v59, %v971_v63  ;;  %v2646_v59 = vld [vmem:[#allocation14 + $0xb0] sm:$0xff]  }
 0x625   :  { %v2485_v12 = vpop.f32.mrf.mxu1  ;;  %v2661_v63 = vld [vmem:[#allocation14 + $0x50] sm:$0xff]  }
 0x626   :  { %v993_v38 = vsub.f32 %v2485_v12, %v991_v0  ;;  %v2662_v0 = vld [vmem:[#allocation14 + $0x90] sm:$0xff]  }
 0x627   :  { %v981_v3 = vpop.f32.mrf.mxu1  ;;  %v2663_v12 = vld [vmem:[#allocation14 + $0x10] sm:$0xff]  }
 0x628   :  { %v997_v4 = vadd.f32 1e-05, %v993_v38  ;;  %v992_v5 = vsub.f32 %v981_v3, %v990_v36  ;;  %v2664_v36 = vld [vmem:[#allocation14 + $0xc8] sm:$0xff]  }
 0x629   :  { %v2665_v38 = vld [vmem:[#allocation14 + $0x48] sm:$0xff]  }
 0x62a   :  { %2684 = vrsqrt.f32 %v997_v4  ;;  %v996_v1 = vadd.f32 1e-05, %v992_v5  ;;  %v2666_v3 = vld [vmem:[#allocation14 + $0x88] sm:$0xff]   ;;  %v2668_v5 = vld [vmem:[#allocation14 + $0xc0] sm:$0xff]  }
 0x62b   :  { %v2667_v4 = vld [vmem:[#allocation14 + $0x8] sm:$0xff]  }
 0x62c   :  { %2686 = vrsqrt.f32 %v996_v1  ;;  %v2669_v1 = vld [vmem:[#allocation14 + $0x40] sm:$0xff]  }
 0x637   :  { %v2685_v7 = vpop.eup %2684 }
 0x638   :  { %v1001_v14 = vmul.f32 %v2685_v7, %v995_v6  ;;  %v2670_v6 = vld [vmem:[#allocation14 + $0x80] sm:$0xff]  }
 0x639   :  { %v2687_v15 = vpop.eup %2686  ;;  %v2671_v7 = vld [vmem:[#allocation14] sm:$0xff]  }
 0x63a   :  { %v1000_v16 = vmul.f32 %v2687_v15, %v994_v13  ;;  %v1009_v17 = vmul.f32 %v2123_v8, %v1001_v14 }
 0x63c   :  { %v1008_v33 = vmul.f32 %v2123_v8, %v1000_v16  ;;  %v3615_v39 = vadd.f32 %v2124_v32, %v1009_v17  ;;  %v1051_v8 = vld [vmem:[#allocation13] sm:$0xf] }
 0x63d   :  { %v1060_v15 = vrot.slane %v1051_v8, %v385_v11  ;;  %v1068_v16 = vrot.slane %v1051_v8, %v393_v52  ;;  %v1056_v17 = vrot.slane %v1051_v8, %v381_v10 }
 0x63e   :  { %v3613_v34 = vadd.f32 %v2124_v32, %v1008_v33  ;;  %v1064_v32 = vrot.slane %v1051_v8, %v389_v31 }
 0x640   :  { %v1018_v42 = vpack.c.bf16 %v3615_v39, %v3613_v34 }
 0x642   :  { %1266 = vmatmul.mubr.bf16.vlgmr.msra.gmra.mxu0 %v1018_v42  ;;  %1309 = vmatmul.mubr.bf16.vlgmr.msra.gmra.mxu1 %v1018_v42 }
 0x643   :  { %2297 = vmatpush3.bf16.msra.mxu1 %v2642_v40  ;;  %2275 = vmatpush3.bf16.msra.mxu0 %v2643_v41 }
 0x644   :  { %2298 = vmatprep.subr.bf16.mxu1 %v2644_v2  ;;  %2276 = vmatprep.subr.bf16.mxu0 %v2645_v43 }
 0x647   :  { %2299 = vmatpush3.bf16.msra.mxu1 %v2646_v59  ;;  %2277 = vmatpush3.bf16.msra.mxu0 %v2647_v44 }
 0x648   :  { %2300 = vmatprep.subr.bf16.mxu1 %v2648_v45  ;;  %2278 = vmatprep.subr.bf16.mxu0 %v2649_v46 }
 0x64b   :  { %2301 = vmatpush3.bf16.msra.mxu1 %v2650_v47  ;;  %2279 = vmatpush3.bf16.msra.mxu0 %v2651_v48 }
 0x64c   :  { %2302 = vmatprep.subr.bf16.mxu1 %v2652_v49  ;;  %2280 = vmatprep.subr.bf16.mxu0 %v2653_v53 }
 0x64f   :  { %2303 = vmatpush3.bf16.msra.mxu1 %v2654_v54  ;;  %2281 = vmatpush3.bf16.msra.mxu0 %v2655_v55 }
 0x650   :  { %2304 = vmatprep.subr.bf16.mxu1 %v2656_v56  ;;  %2282 = vmatprep.subr.bf16.mxu0 %v2657_v57 }
 0x653   :  { %2305 = vmatpush3.bf16.msra.mxu1 %v2658_v58  ;;  %2283 = vmatpush3.bf16.msra.mxu0 %v2659_v61 }
 0x654   :  { %2306 = vmatprep.subr.bf16.mxu1 %v2660_v62  ;;  %2284 = vmatprep.subr.bf16.mxu0 %v2661_v63  ;;  %v1829_v63 = vld [vmem:[%s3721_s15 + $0x18] sm:$0xff] }
 0x657   :  { %2307 = vmatpush3.bf16.msra.mxu1 %v2662_v0  ;;  %2285 = vmatpush3.bf16.msra.mxu0 %v2663_v12  ;;  %v1828_v0 = vld [vmem:[%s3721_s15 + $0x10] sm:$0xff]  ;;  %v1827_v12 = vld [vmem:[%s3721_s15 + $0x8] sm:$0xff] }
 0x658   :  { %2308 = vmatprep.subr.bf16.mxu1 %v2664_v36  ;;  %2286 = vmatprep.subr.bf16.mxu0 %v2665_v38  ;;  %v1826_v36 = vld [vmem:[%s3721_s15] sm:$0xff] }
 0x65b   :  { %2309 = vmatpush3.bf16.msra.mxu1 %v2666_v3  ;;  %2287 = vmatpush3.bf16.msra.mxu0 %v2667_v4 }
 0x65c   :  { %2310 = vmatprep.subr.bf16.mxu1 %v2668_v5  ;;  %2288 = vmatprep.subr.bf16.mxu0 %v2669_v1 }
 0x65f   :  { %2311 = vmatpush3.bf16.msra.mxu1 %v2670_v6  ;;  %2289 = vmatpush3.bf16.msra.mxu0 %v2671_v7 }
 0x660   :  { %2524 = vmatprep.subr.mxu1 %v3035_v30  ;;  %2486 = vmatprep.subr.mxu0 %v3382_v18 }
 0x702   :  { %v1267_v13 = vpop.f32.mrf.mxu0  ;;  %v1310_v14 = vpop.f32.mrf.mxu1 }
 0x703   :  { %v1268_v45 = vadd.f32 %v1267_v13, %v1056_v17  ;;  %v1311_v46 = vadd.f32 %v1310_v14, %v1064_v32 }
 0x704   :  { %v1269_v33 = vpop.f32.mrf.mxu0  ;;  %v1312_v40 = vpop.f32.mrf.mxu1 }
 0x705   :  { %v1270_v2 = vadd.f32 %v1269_v33, %v1060_v15  ;;  %v1313_v43 = vadd.f32 %v1312_v40, %v1068_v16  ;;  %v1319_v55 = vmax.f32 %v1268_v45, 0.0  ;;  %v1321_v56 = vmax.f32 %v1311_v46, 0.0 }
 0x706   :  { %v1271_v41 = vpop.f32.mrf.mxu0  ;;  %v1314_v42 = vpop.f32.mrf.mxu1 }
 0x707   :  { %v1272_v59 = vadd.f32 %v1271_v41, %v1056_v17  ;;  %v1315_v44 = vadd.f32 %v1314_v42, %v1064_v32  ;;  %v1320_v10 = vmax.f32 %v1270_v2, 0.0  ;;  %v1322_v54 = vmax.f32 %v1313_v43, 0.0  ;;  %v1988_v2 = vld [vmem:[#allocation23] sm:$0xf]  ;;  %v2194_v43 = vld [vmem:[#allocation25] ss:$0 sm:$0xff] }
 0x708   :  { %v1273_v11 = vpop.f32.mrf.mxu0  ;;  %v1316_v47 = vpop.f32.mrf.mxu1  ;;  %v3038_v41 = vmov 2   ;;  %v3039_v42 = vmov 3  }
 0x709   :  { %v1274_v48 = vadd.f32 %v1273_v11, %v1060_v15  ;;  %v1317_v52 = vadd.f32 %v1316_v47, %v1068_v16  ;;  %v1323_v49 = vmax.f32 %v1272_v59, 0.0  ;;  %v1325_v53 = vmax.f32 %v1315_v44, 0.0  ;;  %v2195_v11 = vld [vmem:[#allocation25 + $0x1] ss:$0 sm:$0xff] }
 0x70b   :  { %v1324_v9 = vmax.f32 %v1274_v48, 0.0  ;;  %v1326_v31 = vmax.f32 %v1317_v52, 0.0  ;;  %v1327_v61 = vpack.c.bf16 %v1323_v49, %v1319_v55  ;;  %v1329_v62 = vpack.c.bf16 %v1325_v53, %v1321_v56 }
 0x70d   :  { %v1328_v57 = vpack.c.bf16 %v1324_v9, %v1320_v10  ;;  %v1330_v58 = vpack.c.bf16 %v1326_v31, %v1322_v54  ;;  %v2196_v54 = vld [vmem:[#allocation25 + $0x2] ss:$0 sm:$0xff] }
 0x70f   :  { %1626 = vmatprep.mubr.bf16.mxu0 %v1328_v57  ;;  %1667 = vmatprep.mubr.bf16.mxu1 %v1330_v58  ;;  %v2197_v58 = vld [vmem:[#allocation25 + $0x3] ss:$0 sm:$0xff] }
 0x710   :  { %1627 = vmatmul.mubr.bf16.vlgmr.msra.gmra.mxu0 %v1327_v61  ;;  %1668 = vmatmul.mubr.bf16.vlgmr.msra.gmra.mxu1 %v1329_v62 }
 0x711   :  { %2525 = vmatpush3.msra.mxu1 %v1829_v63  ;;  %2532 = vmatprep.mubr.msk.f32.mxu1 %vm3036_vm5, %v3035_v30 }
 0x712   :  { %2526 = vmatprep.subr.mxu1 %v3035_v30  ;;  %2487 = vmatpush3.msra.mxu0 %v3382_v18 }
 0x713   :  { %2527 = vmatpush3.msra.mxu1 %v1828_v0  ;;  %2488 = vmatprep.subr.mxu0 %v3387_v19 }
 0x714   :  { %2528 = vmatprep.subr.mxu1 %v3035_v30  ;;  %2489 = vmatpush3.msra.mxu0 %v3387_v19  ;;  %v2157_v19 = vld [vmem:[#allocation16] ss:$0 sm:$0xff] }
 0x715   :  { %2529 = vmatpush3.msra.mxu1 %v1827_v12  ;;  %2490 = vmatprep.subr.mxu0 %v3394_v20 }
 0x716   :  { %2530 = vmatprep.subr.mxu1 %v3035_v30  ;;  %2491 = vmatpush3.msra.mxu0 %v3394_v20 }
 0x717   :  { %2531 = vmatpush3.msra.mxu1 %v1826_v36  ;;  %2492 = vmatprep.subr.mxu0 %v3401_v21 }
 0x718   :  { %2533 = vmatmul.mubr.msk.f32.vlgmr.msra.gmra.mxu1 %vm439_vm2, %v3298_v60  ;;  %2493 = vmatpush3.msra.mxu0 %v3401_v21  ;;  %vm2072_vm2 = vcmask 1041408  }
 0x719   :  { %2494 = vmatprep.subr.mxu0 %v3408_v22  ;;  %2535 = vmatprep.subr.mxu1 %v3035_v30 }
 0x71a   :  { %2495 = vmatpush3.msra.mxu0 %v3408_v22  ;;  %2537 = vmatprep.mubr.msk.f32.mxu1 %vm3036_vm5, %v3035_v30 }
 0x71b   :  { %2496 = vmatprep.subr.mxu0 %v3415_v23  ;;  %2536 = vmatpush3.msk.msra.mxu1 %vm1993_vm7, %v1988_v2 }
 0x71c   :  { %2497 = vmatpush3.msra.mxu0 %v3415_v23 }
 0x71d   :  { %2498 = vmatprep.subr.mxu0 %v3422_v24 }
 0x71e   :  { %2499 = vmatpush3.msra.mxu0 %v3422_v24 }
 0x71f   :  { %2500 = vmatprep.subr.mxu0 %v3429_v25 }
 0x720   :  { %2501 = vmatpush3.msra.mxu0 %v3429_v25 }
 0x721   :  { %2502 = vmatprep.subr.mxu0 %v3436_v26 }
 0x722   :  { %2503 = vmatpush3.msra.mxu0 %v3436_v26 }
 0x723   :  { %2504 = vmatprep.subr.mxu0 %v3443_v27 }
 0x724   :  { %2505 = vmatpush3.msra.mxu0 %v3443_v27 }
 0x725   :  { %2506 = vmatprep.subr.mxu0 %v3450_v28 }
 0x726   :  { %2507 = vmatpush3.msra.mxu0 %v3450_v28 }
 0x727   :  { %2508 = vmatprep.subr.mxu0 %v3457_v29 }
 0x728   :  { %2509 = vmatpush3.msra.mxu0 %v3457_v29  ;;  %v2192_v29 = vld [vmem:[#allocation20] ss:$0 sm:$0xff] }
 0x729   :  { %2510 = vmatprep.subr.mxu0 %v3473_v50 }
 0x72a   :  { %2511 = vmatpush3.msra.mxu0 %v3473_v50 }
 0x72b   :  { %2512 = vmatprep.subr.mxu0 %v3480_v35 }
 0x72c   :  { %2513 = vmatpush3.msra.mxu0 %v3480_v35 }
 0x72d   :  { %2514 = vmatprep.subr.mxu0 %v3487_v37 }
 0x72e   :  { %2515 = vmatpush3.msra.mxu0 %v3487_v37 }
 0x72f   :  { %2516 = vmatprep.subr.mxu0 %v3494_v51 }
 0x730   :  { %2517 = vmatpush3.msra.mxu0 %v3494_v51 }
 0x7d0   :  { %v2290_v60 = vpop.f32.mrf.mxu0  ;;  %v2312_v18 = vpop.f32.mrf.mxu1 }
 0x7d2   :  { %v2291_v20 = vpop.f32.mrf.mxu0  ;;  %v2313_v21 = vpop.f32.mrf.mxu1 }
 0x7d3   :  { %v2292_v22 = vadd.f32 %v2291_v20, %v2290_v60  ;;  %v2314_v26 = vadd.f32 %v2313_v21, %v2312_v18 }
 0x7d4   :  { %v2293_v23 = vpop.f32.mrf.mxu0  ;;  %v2315_v24 = vpop.f32.mrf.mxu1 }
 0x7d5   :  { %v1629_v25 = vadd.f32 %v2292_v22, %v2157_v19 }
 0x7d6   :  { %v2294_v27 = vpop.f32.mrf.mxu0  ;;  %v2316_v28 = vpop.f32.mrf.mxu1 }
 0x7d7   :  { %v1670_v50 = vadd.f32 %v2314_v26, %v1629_v25  ;;  %v2295_v35 = vadd.f32 %v2294_v27, %v2293_v23  ;;  %v2317_v3 = vadd.f32 %v2316_v28, %v2315_v24 }
 0x7d8   :  { %v1909_v37 = vpop.f32.mrf.mxu1 }
 0x7d9   :  { %v1632_v38 = vadd.f32 %v2295_v35, %v2157_v19  ;;  %v1910_v51 = vadd.f32 %v2192_v29, %v1909_v37  ;;  %v3683_v4 = vadd.f32 %v1670_v50, %v3613_v34  ;;  %v2190_v35 = vld [vmem:[#allocation17] ss:$0 sm:$0xff] }
 0x7da   :  { %v2534_v5 = vpop.f32.mrf.mxu1 }
 0x7db   :  { %v1673_v1 = vadd.f32 %v2317_v3, %v1632_v38  ;;  %2518 = vmatprep.mubr.f32.mxu0 %v3683_v4  ;;  %v1914_v6 = vsel %vm1913_vm6, %v1910_v51, -inf  ;;  %v1680_v8 = vmul.f32 %v3683_v4, %v3683_v4  ;;  %v2191_v3 = vld [vmem:[#allocation19] ss:$0 sm:$0xff] }
 0x7dc   :  { %1915 = vmax.xlane.f32.xlu1 %v1914_v6 }
 0x7dd   :  { %v3688_v7 = vadd.f32 %v1673_v1, %v3615_v39  ;;  %v3037_v39 = vmov 1  }
 0x7de   :  { %2569 = vset.pattern.permute.xlu1 %v3037_v39 }
 0x7df   :  { %2519 = vmatmul.mubr.f32.vlgmr.msra.gmra.mxu0 %v3688_v7  ;;  %v1681_v34 = vmul.f32 %v3688_v7, %v3688_v7 }
 0x7e0   :  { %2521 = vmatprep.mubr.f32.mxu0 %v1680_v8 }
 0x7e3   :  { %2522 = vmatmul.mubr.f32.gmra.mxu0 %v1681_v34 }
 0x865   :  { %v1916_v13 = vpop.xlane.xlu1 %1915 }
 0x866   :  { %v1917_v14 = vsub.f32 %v1910_v51, %v1916_v13 }
 0x868   :  { %v1918_v15 = vmul.f32 1.442695, %v1917_v14 }
 0x86a   :  { %2688 = vpow2.f32 %v1918_v15 }
 0x877   :  { %v2689_v16 = vpop.eup %2688 }
 0x878   :  { %v1920_v17 = vsel %vm1913_vm6, %v2689_v16, 0.0 }
 0x879   :  { %1921 = vadd.xlane.f32.xlu1 %v1920_v17 }
 0x89f   :  { %v2520_v36 = vpop.f32.mrf.mxu0 }
 0x8a0   :  { %v1768_v21 = vmul.f32 %v2520_v36, %v2520_v36  ;;  %v1772_v28 = vsub.f32 %v3688_v7, %v2520_v36 }
 0x8a1   :  { %v1748_v60 = vpop.f32.mrf.mxu0 }
 0x8a2   :  { %v1767_v20 = vmul.f32 %v1748_v60, %v1748_v60  ;;  %v1771_v26 = vsub.f32 %v3683_v4, %v1748_v60 }
 0x8a3   :  { %v2523_v18 = vpop.f32.mrf.mxu0 }
 0x8a4   :  { %v1770_v23 = vsub.f32 %v2523_v18, %v1768_v21 }
 0x8a5   :  { %v1758_v19 = vpop.f32.mrf.mxu0 }
 0x8a6   :  { %v1769_v22 = vsub.f32 %v1758_v19, %v1767_v20  ;;  %v1774_v25 = vadd.f32 1e-05, %v1770_v23 }
 0x8a8   :  { %v1773_v24 = vadd.f32 1e-05, %v1769_v22 }
 0x902   :  { %v1922_v32 = vpop.xlane.xlu1 %1921 }
 0x903   :  { %2690 = vrcp.f32 %v1922_v32 }
 0x904   :  { %2692 = vrsqrt.f32 %v1773_v24 }
 0x905   :  { %2694 = vrsqrt.f32 %v1774_v25 }
 0x910   :  { %v2691_v33 = vpop.eup %2690 }
 0x911   :  { %v1924_v40 = vmul.f32 %v2691_v33, %v2689_v16 }
 0x913   :  { %1942 = vperm.xlu1 %2569, %v1924_v40   ;;  %1927 = vperm.xlu0 %2568, %v1924_v40  }
 0x917   :  { %2570 = vset.pattern.permute.xlu0 %v3038_v41 }
 0x918   :  { %1957 = vperm.xlu0 %2570, %v1924_v40  }
 0x91c   :  { %2571 = vset.pattern.permute.xlu0 %v3039_v42 }
 0x91d   :  { %1972 = vperm.xlu0 %2571, %v1924_v40  }
 0x98e   :  { %v1943_v59 = vpop.permute.xlu1 %1942  ;;  %v1928_v44 = vpop.permute.xlu0 %1927 }
 0x98f   :  { %vm1945_vm8 = vcmp.gt.f32.partialorder %v1943_v59, %v1924_v40  ;;  %vm1930_vm9 = vcmp.gt.f32.partialorder %v1928_v44, %v1924_v40  ;;  %vm1933_vm10 = vcmp.eq.f32.partialorder %v1928_v44, %v1924_v40  ;;  %vm1948_vm11 = vcmp.eq.f32.partialorder %v1943_v59, %v1924_v40  ;;  %v2200_v59 = vld [vmem:[#allocation2] ss:$0 sm:$0xff] }
 0x990   :  { %v1931_v45 = vsel %vm1930_vm9, 1.0, %v3035_v30  ;;  %v1939_v46 = vsel %vm1933_vm10, %v2194_v43, 0.0  ;;  %v1946_v48 = vsel %vm1945_vm8, 1.0, %v3035_v30  ;;  %v1954_v53 = vsel %vm1948_vm11, %v2195_v11, 0.0 }
 0x991   :  { %v1940_v47 = vadd.f32 %v1939_v46, %v1931_v45 }
 0x993   :  { %v1947_v52 = vadd.f32 %v1946_v48, %v1940_v47  ;;  %v1958_v49 = vpop.permute.xlu0 %1957 }
 0x994   :  { %vm1960_vm12 = vcmp.gt.f32.partialorder %v1958_v49, %v1924_v40  ;;  %vm1963_vm13 = vcmp.eq.f32.partialorder %v1958_v49, %v1924_v40 }
 0x995   :  { %v1955_v10 = vadd.f32 %v1954_v53, %v1947_v52  ;;  %v1961_v9 = vsel %vm1960_vm12, 1.0, %v3035_v30  ;;  %v1969_v55 = vsel %vm1963_vm13, %v2196_v54, 0.0 }
 0x997   :  { %v1962_v31 = vadd.f32 %v1961_v9, %v1955_v10 }
 0x998   :  { %v1973_v56 = vpop.permute.xlu0 %1972 }
 0x999   :  { %v1970_v57 = vadd.f32 %v1969_v55, %v1962_v31  ;;  %vm1975_vm14 = vcmp.gt.f32.partialorder %v1973_v56, %v1924_v40  ;;  %vm1978_vm15 = vcmp.eq.f32.partialorder %v1973_v56, %v1924_v40 }
 0x99a   :  { %v1976_v61 = vsel %vm1975_vm14, 1.0, %v3035_v30  ;;  %v1984_v63 = vsel %vm1978_vm15, %v2197_v58, 0.0  ;;  %v2693_v30 = vpop.eup %2692 }
 0x99b   :  { %v1977_v62 = vadd.f32 %v1976_v61, %v1970_v57  ;;  %v2695_v27 = vpop.eup %2694  ;;  %v1777_v29 = vmul.f32 %v2693_v30, %v1771_v26 }
 0x99c   :  { %v1778_v50 = vmul.f32 %v2695_v27, %v1772_v28 }
 0x99d   :  { %v1985_v0 = vadd.f32 %v1984_v63, %v1977_v62  ;;  %v1785_v37 = vmul.f32 %v2190_v35, %v1777_v29 }
 0x99e   :  { %v1786_v38 = vmul.f32 %v2190_v35, %v1778_v50 }
 0x99f   :  { %vm1986_vm1 = vcmp.lt.f32.partialorder %v1985_v0, 2.0  ;;  %v1793_v51 = vadd.f32 %v2191_v3, %v1785_v37 }
 0x9a0   :  { %v1987_v12 = vsel %vm1986_vm1, %v1924_v40, 0.0  ;;  %v1794_v5 = vadd.f32 %v2191_v3, %v1786_v38 }
 0x9a1   :  { %2538 = vmatmul.mubr.msk.f32.vlgmr.msra.gmra.mxu1 %vm1989_vm0, %v1987_v12  ;;  %v1795_v1 = vrot.slane %v1793_v51, 4 }
 0x9a2   :  { %v1801_v6 = vrot.slane %v1794_v5, 4 }
 0x9a3   :  { %v1796_v8 = vadd.f32 %v1795_v1, %v1793_v51 }
 0x9a4   :  { %v1802_v34 = vadd.f32 %v1801_v6, %v1794_v5 }
 0x9a5   :  { %v1797_v13 = vrot.slane %v1796_v8, 2 }
 0x9a6   :  { %v1803_v14 = vrot.slane %v1802_v34, 2 }
 0x9a7   :  { %v1798_v15 = vadd.f32 %v1797_v13, %v1796_v8 }
 0x9a8   :  { %v1804_v16 = vadd.f32 %v1803_v14, %v1802_v34 }
 0x9a9   :  { %v1799_v4 = vrot.slane %v1798_v15, 1 }
 0x9aa   :  { %v1805_v17 = vrot.slane %v1804_v16, 1 }
 0x9ab   :  { %v1800_v39 = vadd.f32 %v1799_v4, %v1798_v15 }
 0x9ac   :  { %v1806_v7 = vadd.f32 %v1805_v17, %v1804_v16 }
 0x9ad   :  { %v1808_v32 = vmul.f32 0.125, %v1800_v39 }
 0x9ae   :  { %v1809_v33 = vmul.f32 0.125, %v1806_v7 }
 0x9b0   :  { %v2069_v41 = vsel %vm1839_vm3, %v1809_v33, %v1808_v32 }
 0xa61   :  { %v2063_v40 = vpop.f32.mrf.mxu1 }
 0xa62   :  { %v2071_v42 = vmul.f32 %v2069_v41, %v2063_v40 }
 0xa63   :  { %v2539_v2 = vpop.f32.mrf.mxu1 }
 0xa64   :  { %v2073_v43 = vsel %vm2072_vm2, %v2071_v42, 0.0 }
 0xa65   :  { %2074 = vadd.xlane.f32.xlu1 %v2073_v43 }
 0xaee   :  { %v2075_v44 = vpop.xlane.xlu1 %2074 }
 0xaef   :  { %v2083_v45 = vadd.f32 %v2200_v59, %v2075_v44 }
 0xaf1   :  { %2085 = vst.msk [vmem:[%s3729_s23] sm:$0x3] %vm2084_vm4, %v2083_v45 }
 0xaf2   :  { %2090 = vsyncpa [#allocation4], 1 }
 0xaf3   :  { %2091 = vsyncpa [#allocation6], 1 }
 0xaf4   :  { %2092 = vsyncpa [#allocation9], 1 }
 0xaf5   :  { %2093 = vsyncpa [#allocation12], 1 }
 0xaf6   :  { %2094 = vsyncpa [#allocation15], 1 }
 0xaf7   :  { %2095 = vsyncpa [#allocation18], 1 }
 0xaf8   :  { %2096 = vsyncpa [#allocation21], 1 }
 0xaf9   :  { %2097 = vsyncpa [#allocation24], 1 }

</bundles_post_ra>
